<compile_context>
chip_gen: v6e
topology: v6e:2x2x1
jax: 0.10.0
libtpu: 0.0.40
codegen_flags: <defaults>
</compile_context>

<pallas_src>
import functools
import math

import numpy as np
import jax
import jax.numpy as jnp
from jax.experimental import pallas as pl
from jax.experimental.pallas import tpu as pltpu


# ----------------------------- fused Pallas kernel ------------------------------ #

def _fused_lstm_regressor_kernel(x_ref, emb_wt_ref, emb_b_ref,
                                 wih_ref, bg_ref, whh_ref,
                                 wh_ref, bh_ref, o_ref, *, T, BP, H):
    """Whole forward pass in one kernel, everything VMEM-resident.

    x_ref:    (T*BP, D_in)  time-major rows (row = t*BP + b), batch padded to BP
    emb_wt:   (D_in, H),  emb_b: (1, H)
    wih:      (H, 8H)   input->gate weights, gate-grouped cols [i|f|g|o], each 2H = [fwd|bwd]
    bg:       (1, 8H)   b_ih + b_hh, same column layout
    whh:      (2H, 8H)  block-diagonal recurrent weights in the same column layout
                        (rows [0:H] = fwd h, rows [H:2H] = bwd h)
    wh:       (T*2H, OUT) (fc2 ∘ fc1) weight, rows permuted to the kernel's step-major order
    bh:       (1, OUT)
    o_ref:    (BP, OUT)
    """
    H2, H4, H6, H8 = 2 * H, 4 * H, 6 * H, 8 * H
    f32 = jnp.float32

    # --- hoisted: embedding + input->gate projection for ALL steps, BOTH directions ---
    emb = jnp.dot(x_ref[...], emb_wt_ref[...],
                  preferred_element_type=f32) + emb_b_ref[...]            # (T*BP, H)
    gx = jnp.dot(emb, wih_ref[...],
                 preferred_element_type=f32) + bg_ref[...]                # (T*BP, 8H)

    # Lane masks for the gate-grouped layout.
    lane = jax.lax.broadcasted_iota(jnp.int32, (BP, H8), 1)
    is_bwd = (lane % H2) >= H                     # backward-direction lanes
    is_g = (lane >= H4) & (lane < H6)             # tanh ("g") gate lanes

    # Time-reverse the backward-direction lanes ONCE (no dependence on the recurrence),
    # so each step of the serial loop reads a single tile-aligned row block.
    gx_steps = []
    for s in range(T):
        gx_steps.append(jnp.where(is_bwd,
                                  gx[(T - 1 - s) * BP:(T - s) * BP, :],   # bwd: time T-1-s
                                  gx[s * BP:(s + 1) * BP, :]))            # fwd: time s

    whh = whh_ref[...]                                                    # (2H, 8H)
    h_both = jnp.zeros((BP, H2), f32)             # [h_fwd | h_bwd]
    c_both = jnp.zeros((BP, H2), f32)             # [c_fwd | c_bwd]
    hs = []

    # Statically unrolled recurrence (T=8): one merged cell drives both directions,
    # one block-diagonal matmul feeds both directions' recurrent gates.
    for s in range(T):
        gates = gx_steps[s] + jnp.dot(h_both, whh,
                                      preferred_element_type=f32)         # (BP, 8H)
        # Whole-vreg activations + one lane select instead of 8 narrow 32-lane slices.
        act = jnp.where(is_g, jnp.tanh(gates), jax.nn.sigmoid(gates))
        i = act[:, 0:H2]
        f = act[:, H2:H4]
        g = act[:, H4:H6]
        o = act[:, H6:H8]
        c_both = f * c_both + i * g
        h_both = o * jnp.tanh(c_both)
        hs.append(h_both)

    # Head (fc2 ∘ fc1) as ONE wide-K matmul after the loop (no per-step N=1 dots).
    hs_flat = jnp.concatenate(hs, axis=-1)                                # (BP, T*2H)
    out = jnp.dot(hs_flat, wh_ref[...], preferred_element_type=f32) + bh_ref[...]
    o_ref[...] = out.astype(o_ref.dtype)


def lstm_regressor_forward(fused, x):
    """x: (B, T, input_dim) -> (B, output_dim). Mirrors LSTMRegressor.forward."""
    B, T, D_in = x.shape
    H = fused["emb_wt"].shape[1]
    OUT = fused["w_head"].shape[1]
    BP = ((B + 7) // 8) * 8           # pad batch to a full sublane tile

    # Time-major, batch-padded 2D layout: row = t*BP + b.
    xt = jnp.transpose(x, (1, 0, 2))                                      # (T, B, D)
    if BP != B:
        xt = jnp.pad(xt, ((0, 0), (0, BP - B), (0, 0)))
    x2 = xt.reshape(T * BP, D_in)

    kernel = functools.partial(_fused_lstm_regressor_kernel, T=T, BP=BP, H=H)
    vmem = pl.BlockSpec(memory_space=pltpu.MemorySpace.VMEM)
    out = pl.pallas_call(
        kernel,
        out_shape=jax.ShapeDtypeStruct((BP, OUT), jnp.float32),
        in_specs=[vmem] * 8,
        out_specs=vmem,
    )(x2, fused["emb_wt"], fused["emb_b"],
      fused["wih"], fused["b_gates"], fused["whh_blk"],
      fused["w_head"], fused["b_head"])
    return out[:B]


# ------------------------- parameters (PyTorch layout) --------------------------- #

def _uniform(key, shape, k):
    return jax.random.uniform(key, shape, jnp.float32, minval=-k, maxval=k)


def init_params(key, input_dim, hidden_dim, seq_len, output_dim):
    H = hidden_dim
    keys = jax.random.split(key, 14)
    k_lin = 1.0 / math.sqrt(input_dim)
    k_lstm = 1.0 / math.sqrt(H)
    k_fc1 = 1.0 / math.sqrt(H * seq_len * 2)
    k_fc2 = 1.0 / math.sqrt(128)
    return {
        # embedding: Linear(input_dim, hidden_dim)
        "emb_w": _uniform(keys[0], (H, input_dim), k_lin),
        "emb_b": _uniform(keys[1], (H,), k_lin),
        # LSTM forward direction (PyTorch gate order i, f, g, o)
        "wih_f": _uniform(keys[2], (4 * H, H), k_lstm),
        "whh_f": _uniform(keys[3], (4 * H, H), k_lstm),
        "bih_f": _uniform(keys[4], (4 * H,), k_lstm),
        "bhh_f": _uniform(keys[5], (4 * H,), k_lstm),
        # LSTM backward direction
        "wih_b": _uniform(keys[6], (4 * H, H), k_lstm),
        "whh_b": _uniform(keys[7], (4 * H, H), k_lstm),
        "bih_b": _uniform(keys[8], (4 * H,), k_lstm),
        "bhh_b": _uniform(keys[9], (4 * H,), k_lstm),
        # fc1: Linear(hidden_dim * seq_len * 2, 128)  (module hard-codes seq_len=2148)
        "fc1_w": _uniform(keys[10], (128, H * seq_len * 2), k_fc1),
        "fc1_b": _uniform(keys[11], (128,), k_fc1),
        # fc2: Linear(128, output_dim)
        "fc2_w": _uniform(keys[12], (output_dim, 128), k_fc2),
        "fc2_b": _uniform(keys[13], (output_dim,), k_fc2),
    }


def fuse_params(p):
    """One-time precompose / pre-transpose / re-layout of the PyTorch-layout parameters."""
    H = p["emb_w"].shape[0]
    T = p["fc1_w"].shape[1] // (2 * H)

    # Column permutation: PyTorch direction-grouped [fwd i,f,g,o | bwd i,f,g,o]
    #   -> gate-grouped [i_f,i_b | f_f,f_b | g_f,g_b | o_f,o_b].
    perm = np.empty(8 * H, dtype=np.int32)
    for k in range(4):           # gate
        for d in range(2):       # direction
            perm[k * 2 * H + d * H: k * 2 * H + (d + 1) * H] = d * 4 * H + k * H + np.arange(H)

    wih_old = jnp.concatenate([p["wih_f"].T, p["wih_b"].T], axis=1)       # (H, 8H)
    bg_old = jnp.concatenate([p["bih_f"] + p["bhh_f"], p["bih_b"] + p["bhh_b"]])
    whh_old = jnp.zeros((2 * H, 8 * H), jnp.float32)
    whh_old = whh_old.at[:H, :4 * H].set(p["whh_f"].T)
    whh_old = whh_old.at[H:, 4 * H:].set(p["whh_b"].T)

    # fc2 ∘ fc1 (no nonlinearity between them): y = flat @ w_head + b_head
    w_head = (p["fc2_w"] @ p["fc1_w"]).T                                  # (T*2H, OUT)
    b_head = (p["fc2_w"] @ p["fc1_b"] + p["fc2_b"]).reshape(1, -1)        # (1, OUT)

    # Row permutation of the head weight: kernel collects [h_fwd(t=s) | h_bwd(t=T-1-s)]
    # at step s; remap to PyTorch's time-major flatten out.view(B, -1).
    head_perm = np.empty(T * 2 * H, dtype=np.int32)
    for s in range(T):
        head_perm[s * 2 * H: s * 2 * H + H] = s * 2 * H + np.arange(H)                 # fwd, t=s
        head_perm[s * 2 * H + H: (s + 1) * 2 * H] = (T - 1 - s) * 2 * H + H + np.arange(H)  # bwd, t=T-1-s

    return {
        "emb_wt": p["emb_w"].T,                       # (D_in, H)
        "emb_b": p["emb_b"].reshape(1, -1),           # (1, H)
        "wih": wih_old[:, perm],                      # (H, 8H)  gate-grouped
        "b_gates": bg_old[perm].reshape(1, -1),       # (1, 8H)
        "whh_blk": whh_old[:, perm],                  # (2H, 8H)
        "w_head": w_head[head_perm, :],               # (T*2H, OUT) step-major rows
        "b_head": b_head,                             # (1, OUT)
    }


# ------------------------------------ main --------------------------------------- #

if __name__ == "__main__":
    B, T, D_IN, H, OUT = 2, 8, 4, 32, 1

    key = jax.random.PRNGKey(0)
    kx, kp = jax.random.split(key)
    x = jax.random.normal(kx, (B, T, D_IN), jnp.float32)

    params = init_params(kp, D_IN, H, T, OUT)
    fused = fuse_params(params)          # done once, outside the hot path

    # TODO(synk): self.linears (unused nn.Sequential with Dropout/ReLU) is never called
    # in forward(), so it is intentionally not implemented.
    fwd = jax.jit(lambda inp: lstm_regressor_forward(fused, inp))
    y = fwd(x)
    jax.block_until_ready(y)

    assert y.shape == (B, OUT), y.shape
    assert bool(jnp.all(jnp.isfinite(y)))
    print("KERNEL_OK")
</pallas_src>

<mosaic_0001>
module attributes {stable_mosaic.version = 11 : i64} {
  func.func @_fused_lstm_regressor_kernel(%arg0: memref<64x4xf32, #tpu.memory_space<vmem>>, %arg1: memref<4x32xf32, #tpu.memory_space<vmem>>, %arg2: memref<1x32xf32, #tpu.memory_space<vmem>>, %arg3: memref<32x256xf32, #tpu.memory_space<vmem>>, %arg4: memref<1x256xf32, #tpu.memory_space<vmem>>, %arg5: memref<64x256xf32, #tpu.memory_space<vmem>>, %arg6: memref<512x1xf32, #tpu.memory_space<vmem>>, %arg7: memref<1x1xf32, #tpu.memory_space<vmem>>, %arg8: memref<8x1xf32, #tpu.memory_space<vmem>>) attributes {dimension_semantics = [], scalar_prefetch = 0 : i64, scratch_operands = 0 : i64, tpu.core_type = #tpu.core_type<tc>} {
    %c0 = arith.constant 0 : index
    %c0_0 = arith.constant 0 : index
    %0 = vector.load %arg0[%c0, %c0_0] : memref<64x4xf32, #tpu.memory_space<vmem>>, vector<64x4xf32>
    %c0_1 = arith.constant 0 : index
    %c0_2 = arith.constant 0 : index
    %1 = vector.load %arg1[%c0_1, %c0_2] : memref<4x32xf32, #tpu.memory_space<vmem>>, vector<4x32xf32>
    %cst = arith.constant dense<0.000000e+00> : vector<64x32xf32>
    %2 = tpu.matmul %0, %1, %cst {dimension_numbers = #tpu.dot_dimension_numbers<[1], [0], [0], [1], [0, 0, 1, 1], [], []>} : vector<64x4xf32>, vector<4x32xf32>, vector<64x32xf32> -> vector<64x32xf32>
    %c0_3 = arith.constant 0 : index
    %c0_4 = arith.constant 0 : index
    %3 = vector.load %arg2[%c0_3, %c0_4] : memref<1x32xf32, #tpu.memory_space<vmem>>, vector<1x32xf32>
    %4 = vector.broadcast %3 : vector<1x32xf32> to vector<64x32xf32>
    %5 = arith.addf %2, %4 : vector<64x32xf32>
    %c0_5 = arith.constant 0 : index
    %c0_6 = arith.constant 0 : index
    %6 = vector.load %arg3[%c0_5, %c0_6] : memref<32x256xf32, #tpu.memory_space<vmem>>, vector<32x256xf32>
    %cst_7 = arith.constant dense<0.000000e+00> : vector<64x256xf32>
    %7 = tpu.matmul %5, %6, %cst_7 {dimension_numbers = #tpu.dot_dimension_numbers<[1], [0], [0], [1], [0, 0, 1, 1], [], []>} : vector<64x32xf32>, vector<32x256xf32>, vector<64x256xf32> -> vector<64x256xf32>
    %c0_8 = arith.constant 0 : index
    %c0_9 = arith.constant 0 : index
    %8 = vector.load %arg4[%c0_8, %c0_9] : memref<1x256xf32, #tpu.memory_space<vmem>>, vector<1x256xf32>
    %9 = vector.broadcast %8 : vector<1x256xf32> to vector<64x256xf32>
    %10 = arith.addf %7, %9 : vector<64x256xf32>
    %11 = tpu.iota {dimensions = array<i32: 1>} : vector<8x256xi32>
    %c64_i32 = arith.constant 64 : i32
    %c0_i32 = arith.constant 0 : i32
    %12 = arith.cmpi eq, %c64_i32, %c0_i32 : i32
    %c1_i32 = arith.constant 1 : i32
    %13 = arith.select %12, %c1_i32, %c64_i32 : i32
    %14 = vector.broadcast %13 : i32 to vector<8x256xi32>
    %15 = arith.remsi %11, %14 : vector<8x256xi32>
    %c0_i32_10 = arith.constant 0 : i32
    %16 = vector.broadcast %c0_i32_10 : i32 to vector<8x256xi32>
    %17 = arith.cmpi ne, %15, %16 : vector<8x256xi32>
    %c0_i32_11 = arith.constant 0 : i32
    %18 = vector.broadcast %c0_i32_11 : i32 to vector<8x256xi32>
    %19 = arith.cmpi slt, %15, %18 : vector<8x256xi32>
    %c0_i32_12 = arith.constant 0 : i32
    %20 = arith.cmpi slt, %13, %c0_i32_12 : i32
    %21 = vector.broadcast %20 : i1 to vector<8x256xi1>
    %22 = vector.broadcast %21 : vector<8x256xi1> to vector<8x256xi1>
    %23 = arith.xori %19, %22 : vector<8x256xi1>
    %24 = arith.andi %23, %17 : vector<8x256xi1>
    %25 = vector.broadcast %13 : i32 to vector<8x256xi32>
    %26 = arith.addi %15, %25 : vector<8x256xi32>
    %27 = arith.select %24, %26, %15 : vector<8x256xi1>, vector<8x256xi32>
    %c32_i32 = arith.constant 32 : i32
    %28 = vector.broadcast %c32_i32 : i32 to vector<8x256xi32>
    %29 = arith.cmpi sge, %27, %28 : vector<8x256xi32>
    %c128_i32 = arith.constant 128 : i32
    %30 = vector.broadcast %c128_i32 : i32 to vector<8x256xi32>
    %31 = arith.cmpi sge, %11, %30 : vector<8x256xi32>
    %c192_i32 = arith.constant 192 : i32
    %32 = vector.broadcast %c192_i32 : i32 to vector<8x256xi32>
    %33 = arith.cmpi slt, %11, %32 : vector<8x256xi32>
    %34 = arith.andi %31, %33 : vector<8x256xi1>
    %35 = vector.extract_strided_slice %10 {offsets = [56, 0], sizes = [8, 256], strides = [1, 1]} : vector<64x256xf32> to vector<8x256xf32>
    %36 = vector.extract_strided_slice %10 {offsets = [0, 0], sizes = [8, 256], strides = [1, 1]} : vector<64x256xf32> to vector<8x256xf32>
    %37 = arith.select %29, %35, %36 : vector<8x256xi1>, vector<8x256xf32>
    %38 = vector.extract_strided_slice %10 {offsets = [48, 0], sizes = [8, 256], strides = [1, 1]} : vector<64x256xf32> to vector<8x256xf32>
    %39 = vector.extract_strided_slice %10 {offsets = [8, 0], sizes = [8, 256], strides = [1, 1]} : vector<64x256xf32> to vector<8x256xf32>
    %40 = arith.select %29, %38, %39 : vector<8x256xi1>, vector<8x256xf32>
    %41 = vector.extract_strided_slice %10 {offsets = [40, 0], sizes = [8, 256], strides = [1, 1]} : vector<64x256xf32> to vector<8x256xf32>
    %42 = vector.extract_strided_slice %10 {offsets = [16, 0], sizes = [8, 256], strides = [1, 1]} : vector<64x256xf32> to vector<8x256xf32>
    %43 = arith.select %29, %41, %42 : vector<8x256xi1>, vector<8x256xf32>
    %44 = vector.extract_strided_slice %10 {offsets = [32, 0], sizes = [8, 256], strides = [1, 1]} : vector<64x256xf32> to vector<8x256xf32>
    %45 = vector.extract_strided_slice %10 {offsets = [24, 0], sizes = [8, 256], strides = [1, 1]} : vector<64x256xf32> to vector<8x256xf32>
    %46 = arith.select %29, %44, %45 : vector<8x256xi1>, vector<8x256xf32>
    %47 = vector.extract_strided_slice %10 {offsets = [24, 0], sizes = [8, 256], strides = [1, 1]} : vector<64x256xf32> to vector<8x256xf32>
    %48 = vector.extract_strided_slice %10 {offsets = [32, 0], sizes = [8, 256], strides = [1, 1]} : vector<64x256xf32> to vector<8x256xf32>
    %49 = arith.select %29, %47, %48 : vector<8x256xi1>, vector<8x256xf32>
    %50 = vector.extract_strided_slice %10 {offsets = [16, 0], sizes = [8, 256], strides = [1, 1]} : vector<64x256xf32> to vector<8x256xf32>
    %51 = vector.extract_strided_slice %10 {offsets = [40, 0], sizes = [8, 256], strides = [1, 1]} : vector<64x256xf32> to vector<8x256xf32>
    %52 = arith.select %29, %50, %51 : vector<8x256xi1>, vector<8x256xf32>
    %53 = vector.extract_strided_slice %10 {offsets = [8, 0], sizes = [8, 256], strides = [1, 1]} : vector<64x256xf32> to vector<8x256xf32>
    %54 = vector.extract_strided_slice %10 {offsets = [48, 0], sizes = [8, 256], strides = [1, 1]} : vector<64x256xf32> to vector<8x256xf32>
    %55 = arith.select %29, %53, %54 : vector<8x256xi1>, vector<8x256xf32>
    %56 = vector.extract_strided_slice %10 {offsets = [0, 0], sizes = [8, 256], strides = [1, 1]} : vector<64x256xf32> to vector<8x256xf32>
    %57 = vector.extract_strided_slice %10 {offsets = [56, 0], sizes = [8, 256], strides = [1, 1]} : vector<64x256xf32> to vector<8x256xf32>
    %58 = arith.select %29, %56, %57 : vector<8x256xi1>, vector<8x256xf32>
    %c0_13 = arith.constant 0 : index
    %c0_14 = arith.constant 0 : index
    %59 = vector.load %arg5[%c0_13, %c0_14] : memref<64x256xf32, #tpu.memory_space<vmem>>, vector<64x256xf32>
    %cst_15 = arith.constant 0.000000e+00 : f32
    %60 = vector.broadcast %cst_15 : f32 to vector<8x64xf32>
    %cst_16 = arith.constant 0.000000e+00 : f32
    %61 = vector.broadcast %cst_16 : f32 to vector<8x64xf32>
    %cst_17 = arith.constant dense<0.000000e+00> : vector<8x256xf32>
    %62 = tpu.matmul %60, %59, %cst_17 {dimension_numbers = #tpu.dot_dimension_numbers<[1], [0], [0], [1], [0, 0, 1, 1], [], []>} : vector<8x64xf32>, vector<64x256xf32>, vector<8x256xf32> -> vector<8x256xf32>
    %63 = arith.addf %37, %62 : vector<8x256xf32>
    %64 = math.tanh %63 : vector<8x256xf32>
    %65 = arith.negf %63 : vector<8x256xf32>
    %66 = math.exp %65 : vector<8x256xf32>
    %cst_18 = arith.constant 1.000000e+00 : f32
    %67 = vector.broadcast %cst_18 : f32 to vector<8x256xf32>
    %68 = arith.addf %67, %66 : vector<8x256xf32>
    %69 = arith.divf %67, %68 : vector<8x256xf32>
    %70 = arith.select %34, %64, %69 : vector<8x256xi1>, vector<8x256xf32>
    %71 = vector.extract_strided_slice %70 {offsets = [0, 0], sizes = [8, 64], strides = [1, 1]} : vector<8x256xf32> to vector<8x64xf32>
    %72 = vector.extract_strided_slice %70 {offsets = [0, 64], sizes = [8, 64], strides = [1, 1]} : vector<8x256xf32> to vector<8x64xf32>
    %73 = vector.extract_strided_slice %70 {offsets = [0, 128], sizes = [8, 64], strides = [1, 1]} : vector<8x256xf32> to vector<8x64xf32>
    %74 = vector.extract_strided_slice %70 {offsets = [0, 192], sizes = [8, 64], strides = [1, 1]} : vector<8x256xf32> to vector<8x64xf32>
    %75 = arith.mulf %72, %61 : vector<8x64xf32>
    %76 = arith.mulf %71, %73 : vector<8x64xf32>
    %77 = arith.addf %75, %76 : vector<8x64xf32>
    %78 = math.tanh %77 : vector<8x64xf32>
    %79 = arith.mulf %74, %78 : vector<8x64xf32>
    %cst_19 = arith.constant dense<0.000000e+00> : vector<8x256xf32>
    %80 = tpu.matmul %79, %59, %cst_19 {dimension_numbers = #tpu.dot_dimension_numbers<[1], [0], [0], [1], [0, 0, 1, 1], [], []>} : vector<8x64xf32>, vector<64x256xf32>, vector<8x256xf32> -> vector<8x256xf32>
    %81 = arith.addf %40, %80 : vector<8x256xf32>
    %82 = math.tanh %81 : vector<8x256xf32>
    %83 = arith.negf %81 : vector<8x256xf32>
    %84 = math.exp %83 : vector<8x256xf32>
    %cst_20 = arith.constant 1.000000e+00 : f32
    %85 = vector.broadcast %cst_20 : f32 to vector<8x256xf32>
    %86 = arith.addf %85, %84 : vector<8x256xf32>
    %87 = arith.divf %85, %86 : vector<8x256xf32>
    %88 = arith.select %34, %82, %87 : vector<8x256xi1>, vector<8x256xf32>
    %89 = vector.extract_strided_slice %88 {offsets = [0, 0], sizes = [8, 64], strides = [1, 1]} : vector<8x256xf32> to vector<8x64xf32>
    %90 = vector.extract_strided_slice %88 {offsets = [0, 64], sizes = [8, 64], strides = [1, 1]} : vector<8x256xf32> to vector<8x64xf32>
    %91 = vector.extract_strided_slice %88 {offsets = [0, 128], sizes = [8, 64], strides = [1, 1]} : vector<8x256xf32> to vector<8x64xf32>
    %92 = vector.extract_strided_slice %88 {offsets = [0, 192], sizes = [8, 64], strides = [1, 1]} : vector<8x256xf32> to vector<8x64xf32>
    %93 = arith.mulf %90, %77 : vector<8x64xf32>
    %94 = arith.mulf %89, %91 : vector<8x64xf32>
    %95 = arith.addf %93, %94 : vector<8x64xf32>
    %96 = math.tanh %95 : vector<8x64xf32>
    %97 = arith.mulf %92, %96 : vector<8x64xf32>
    %cst_21 = arith.constant dense<0.000000e+00> : vector<8x256xf32>
    %98 = tpu.matmul %97, %59, %cst_21 {dimension_numbers = #tpu.dot_dimension_numbers<[1], [0], [0], [1], [0, 0, 1, 1], [], []>} : vector<8x64xf32>, vector<64x256xf32>, vector<8x256xf32> -> vector<8x256xf32>
    %99 = arith.addf %43, %98 : vector<8x256xf32>
    %100 = math.tanh %99 : vector<8x256xf32>
    %101 = arith.negf %99 : vector<8x256xf32>
    %102 = math.exp %101 : vector<8x256xf32>
    %cst_22 = arith.constant 1.000000e+00 : f32
    %103 = vector.broadcast %cst_22 : f32 to vector<8x256xf32>
    %104 = arith.addf %103, %102 : vector<8x256xf32>
    %105 = arith.divf %103, %104 : vector<8x256xf32>
    %106 = arith.select %34, %100, %105 : vector<8x256xi1>, vector<8x256xf32>
    %107 = vector.extract_strided_slice %106 {offsets = [0, 0], sizes = [8, 64], strides = [1, 1]} : vector<8x256xf32> to vector<8x64xf32>
    %108 = vector.extract_strided_slice %106 {offsets = [0, 64], sizes = [8, 64], strides = [1, 1]} : vector<8x256xf32> to vector<8x64xf32>
    %109 = vector.extract_strided_slice %106 {offsets = [0, 128], sizes = [8, 64], strides = [1, 1]} : vector<8x256xf32> to vector<8x64xf32>
    %110 = vector.extract_strided_slice %106 {offsets = [0, 192], sizes = [8, 64], strides = [1, 1]} : vector<8x256xf32> to vector<8x64xf32>
    %111 = arith.mulf %108, %95 : vector<8x64xf32>
    %112 = arith.mulf %107, %109 : vector<8x64xf32>
    %113 = arith.addf %111, %112 : vector<8x64xf32>
    %114 = math.tanh %113 : vector<8x64xf32>
    %115 = arith.mulf %110, %114 : vector<8x64xf32>
    %cst_23 = arith.constant dense<0.000000e+00> : vector<8x256xf32>
    %116 = tpu.matmul %115, %59, %cst_23 {dimension_numbers = #tpu.dot_dimension_numbers<[1], [0], [0], [1], [0, 0, 1, 1], [], []>} : vector<8x64xf32>, vector<64x256xf32>, vector<8x256xf32> -> vector<8x256xf32>
    %117 = arith.addf %46, %116 : vector<8x256xf32>
    %118 = math.tanh %117 : vector<8x256xf32>
    %119 = arith.negf %117 : vector<8x256xf32>
    %120 = math.exp %119 : vector<8x256xf32>
    %cst_24 = arith.constant 1.000000e+00 : f32
    %121 = vector.broadcast %cst_24 : f32 to vector<8x256xf32>
    %122 = arith.addf %121, %120 : vector<8x256xf32>
    %123 = arith.divf %121, %122 : vector<8x256xf32>
    %124 = arith.select %34, %118, %123 : vector<8x256xi1>, vector<8x256xf32>
    %125 = vector.extract_strided_slice %124 {offsets = [0, 0], sizes = [8, 64], strides = [1, 1]} : vector<8x256xf32> to vector<8x64xf32>
    %126 = vector.extract_strided_slice %124 {offsets = [0, 64], sizes = [8, 64], strides = [1, 1]} : vector<8x256xf32> to vector<8x64xf32>
    %127 = vector.extract_strided_slice %124 {offsets = [0, 128], sizes = [8, 64], strides = [1, 1]} : vector<8x256xf32> to vector<8x64xf32>
    %128 = vector.extract_strided_slice %124 {offsets = [0, 192], sizes = [8, 64], strides = [1, 1]} : vector<8x256xf32> to vector<8x64xf32>
    %129 = arith.mulf %126, %113 : vector<8x64xf32>
    %130 = arith.mulf %125, %127 : vector<8x64xf32>
    %131 = arith.addf %129, %130 : vector<8x64xf32>
    %132 = math.tanh %131 : vector<8x64xf32>
    %133 = arith.mulf %128, %132 : vector<8x64xf32>
    %cst_25 = arith.constant dense<0.000000e+00> : vector<8x256xf32>
    %134 = tpu.matmul %133, %59, %cst_25 {dimension_numbers = #tpu.dot_dimension_numbers<[1], [0], [0], [1], [0, 0, 1, 1], [], []>} : vector<8x64xf32>, vector<64x256xf32>, vector<8x256xf32> -> vector<8x256xf32>
    %135 = arith.addf %49, %134 : vector<8x256xf32>
    %136 = math.tanh %135 : vector<8x256xf32>
    %137 = arith.negf %135 : vector<8x256xf32>
    %138 = math.exp %137 : vector<8x256xf32>
    %cst_26 = arith.constant 1.000000e+00 : f32
    %139 = vector.broadcast %cst_26 : f32 to vector<8x256xf32>
    %140 = arith.addf %139, %138 : vector<8x256xf32>
    %141 = arith.divf %139, %140 : vector<8x256xf32>
    %142 = arith.select %34, %136, %141 : vector<8x256xi1>, vector<8x256xf32>
    %143 = vector.extract_strided_slice %142 {offsets = [0, 0], sizes = [8, 64], strides = [1, 1]} : vector<8x256xf32> to vector<8x64xf32>
    %144 = vector.extract_strided_slice %142 {offsets = [0, 64], sizes = [8, 64], strides = [1, 1]} : vector<8x256xf32> to vector<8x64xf32>
    %145 = vector.extract_strided_slice %142 {offsets = [0, 128], sizes = [8, 64], strides = [1, 1]} : vector<8x256xf32> to vector<8x64xf32>
    %146 = vector.extract_strided_slice %142 {offsets = [0, 192], sizes = [8, 64], strides = [1, 1]} : vector<8x256xf32> to vector<8x64xf32>
    %147 = arith.mulf %144, %131 : vector<8x64xf32>
    %148 = arith.mulf %143, %145 : vector<8x64xf32>
    %149 = arith.addf %147, %148 : vector<8x64xf32>
    %150 = math.tanh %149 : vector<8x64xf32>
    %151 = arith.mulf %146, %150 : vector<8x64xf32>
    %cst_27 = arith.constant dense<0.000000e+00> : vector<8x256xf32>
    %152 = tpu.matmul %151, %59, %cst_27 {dimension_numbers = #tpu.dot_dimension_numbers<[1], [0], [0], [1], [0, 0, 1, 1], [], []>} : vector<8x64xf32>, vector<64x256xf32>, vector<8x256xf32> -> vector<8x256xf32>
    %153 = arith.addf %52, %152 : vector<8x256xf32>
    %154 = math.tanh %153 : vector<8x256xf32>
    %155 = arith.negf %153 : vector<8x256xf32>
    %156 = math.exp %155 : vector<8x256xf32>
    %cst_28 = arith.constant 1.000000e+00 : f32
    %157 = vector.broadcast %cst_28 : f32 to vector<8x256xf32>
    %158 = arith.addf %157, %156 : vector<8x256xf32>
    %159 = arith.divf %157, %158 : vector<8x256xf32>
    %160 = arith.select %34, %154, %159 : vector<8x256xi1>, vector<8x256xf32>
    %161 = vector.extract_strided_slice %160 {offsets = [0, 0], sizes = [8, 64], strides = [1, 1]} : vector<8x256xf32> to vector<8x64xf32>
    %162 = vector.extract_strided_slice %160 {offsets = [0, 64], sizes = [8, 64], strides = [1, 1]} : vector<8x256xf32> to vector<8x64xf32>
    %163 = vector.extract_strided_slice %160 {offsets = [0, 128], sizes = [8, 64], strides = [1, 1]} : vector<8x256xf32> to vector<8x64xf32>
    %164 = vector.extract_strided_slice %160 {offsets = [0, 192], sizes = [8, 64], strides = [1, 1]} : vector<8x256xf32> to vector<8x64xf32>
    %165 = arith.mulf %162, %149 : vector<8x64xf32>
    %166 = arith.mulf %161, %163 : vector<8x64xf32>
    %167 = arith.addf %165, %166 : vector<8x64xf32>
    %168 = math.tanh %167 : vector<8x64xf32>
    %169 = arith.mulf %164, %168 : vector<8x64xf32>
    %cst_29 = arith.constant dense<0.000000e+00> : vector<8x256xf32>
    %170 = tpu.matmul %169, %59, %cst_29 {dimension_numbers = #tpu.dot_dimension_numbers<[1], [0], [0], [1], [0, 0, 1, 1], [], []>} : vector<8x64xf32>, vector<64x256xf32>, vector<8x256xf32> -> vector<8x256xf32>
    %171 = arith.addf %55, %170 : vector<8x256xf32>
    %172 = math.tanh %171 : vector<8x256xf32>
    %173 = arith.negf %171 : vector<8x256xf32>
    %174 = math.exp %173 : vector<8x256xf32>
    %cst_30 = arith.constant 1.000000e+00 : f32
    %175 = vector.broadcast %cst_30 : f32 to vector<8x256xf32>
    %176 = arith.addf %175, %174 : vector<8x256xf32>
    %177 = arith.divf %175, %176 : vector<8x256xf32>
    %178 = arith.select %34, %172, %177 : vector<8x256xi1>, vector<8x256xf32>
    %179 = vector.extract_strided_slice %178 {offsets = [0, 0], sizes = [8, 64], strides = [1, 1]} : vector<8x256xf32> to vector<8x64xf32>
    %180 = vector.extract_strided_slice %178 {offsets = [0, 64], sizes = [8, 64], strides = [1, 1]} : vector<8x256xf32> to vector<8x64xf32>
    %181 = vector.extract_strided_slice %178 {offsets = [0, 128], sizes = [8, 64], strides = [1, 1]} : vector<8x256xf32> to vector<8x64xf32>
    %182 = vector.extract_strided_slice %178 {offsets = [0, 192], sizes = [8, 64], strides = [1, 1]} : vector<8x256xf32> to vector<8x64xf32>
    %183 = arith.mulf %180, %167 : vector<8x64xf32>
    %184 = arith.mulf %179, %181 : vector<8x64xf32>
    %185 = arith.addf %183, %184 : vector<8x64xf32>
    %186 = math.tanh %185 : vector<8x64xf32>
    %187 = arith.mulf %182, %186 : vector<8x64xf32>
    %cst_31 = arith.constant dense<0.000000e+00> : vector<8x256xf32>
    %188 = tpu.matmul %187, %59, %cst_31 {dimension_numbers = #tpu.dot_dimension_numbers<[1], [0], [0], [1], [0, 0, 1, 1], [], []>} : vector<8x64xf32>, vector<64x256xf32>, vector<8x256xf32> -> vector<8x256xf32>
    %189 = arith.addf %58, %188 : vector<8x256xf32>
    %190 = math.tanh %189 : vector<8x256xf32>
    %191 = arith.negf %189 : vector<8x256xf32>
    %192 = math.exp %191 : vector<8x256xf32>
    %cst_32 = arith.constant 1.000000e+00 : f32
    %193 = vector.broadcast %cst_32 : f32 to vector<8x256xf32>
    %194 = arith.addf %193, %192 : vector<8x256xf32>
    %195 = arith.divf %193, %194 : vector<8x256xf32>
    %196 = arith.select %34, %190, %195 : vector<8x256xi1>, vector<8x256xf32>
    %197 = vector.extract_strided_slice %196 {offsets = [0, 0], sizes = [8, 64], strides = [1, 1]} : vector<8x256xf32> to vector<8x64xf32>
    %198 = vector.extract_strided_slice %196 {offsets = [0, 64], sizes = [8, 64], strides = [1, 1]} : vector<8x256xf32> to vector<8x64xf32>
    %199 = vector.extract_strided_slice %196 {offsets = [0, 128], sizes = [8, 64], strides = [1, 1]} : vector<8x256xf32> to vector<8x64xf32>
    %200 = vector.extract_strided_slice %196 {offsets = [0, 192], sizes = [8, 64], strides = [1, 1]} : vector<8x256xf32> to vector<8x64xf32>
    %201 = arith.mulf %198, %185 : vector<8x64xf32>
    %202 = arith.mulf %197, %199 : vector<8x64xf32>
    %203 = arith.addf %201, %202 : vector<8x64xf32>
    %204 = math.tanh %203 : vector<8x64xf32>
    %205 = arith.mulf %200, %204 : vector<8x64xf32>
    %206 = tpu.concatenate %79, %97, %115, %133, %151, %169, %187, %205 in 1 : vector<8x64xf32>, vector<8x64xf32>, vector<8x64xf32>, vector<8x64xf32>, vector<8x64xf32>, vector<8x64xf32>, vector<8x64xf32>, vector<8x64xf32> -> vector<8x512xf32>
    %c0_33 = arith.constant 0 : index
    %c0_34 = arith.constant 0 : index
    %207 = vector.load %arg6[%c0_33, %c0_34] : memref<512x1xf32, #tpu.memory_space<vmem>>, vector<512x1xf32>
    %cst_35 = arith.constant dense<0.000000e+00> : vector<8x1xf32>
    %208 = tpu.matmul %206, %207, %cst_35 {dimension_numbers = #tpu.dot_dimension_numbers<[1], [0], [0], [1], [0, 0, 1, 1], [], []>} : vector<8x512xf32>, vector<512x1xf32>, vector<8x1xf32> -> vector<8x1xf32>
    %c0_36 = arith.constant 0 : index
    %c0_37 = arith.constant 0 : index
    %209 = vector.load %arg7[%c0_36, %c0_37] : memref<1x1xf32, #tpu.memory_space<vmem>>, vector<1x1xf32>
    %210 = vector.broadcast %209 : vector<1x1xf32> to vector<8x1xf32>
    %211 = arith.addf %208, %210 : vector<8x1xf32>
    %c0_38 = arith.constant 0 : index
    %c0_39 = arith.constant 0 : index
    %212 = vector.load %arg8[%c0_38, %c0_39] : memref<8x1xf32, #tpu.memory_space<vmem>>, vector<8x1xf32>
    tpu.vector_store %arg8[%c0_38, %c0_39], %211 {strides = array<i32>} : memref<8x1xf32, #tpu.memory_space<vmem>>, vector<8x1xf32>,
    return
  }
}

</mosaic_0001>

<bundles_post_ra>
// kernel: _lambda_.1
= control target key start
LH: loop header
LB: loop body
LE: loop exit
PB: predicated region body
PF: predicated region fallthrough
CT: control target
= control target key end

     0   :  { %s2333_s0 = inlined_call_operand.vmem [shape: f32[64,4], index: 0, kind: input, shape index: {}]   ;;  %s2334_s1 = inlined_call_operand.vmem [shape: f32[4,32], index: 1, kind: input, shape index: {}]   ;;  %s2335_s2 = inlined_call_operand.vmem [shape: f32[1,32], index: 2, kind: input, shape index: {}]   ;;  %s2336_s3 = inlined_call_operand.vmem [shape: f32[32,256], index: 3, kind: input, shape index: {}]   ;;  %s2337_s4 = inlined_call_operand.vmem [shape: f32[1,256], index: 4, kind: input, shape index: {}]   ;;  %s2338_s5 = inlined_call_operand.hbm [shape: f32[64,256], index: 5, kind: input, shape index: {}]   ;;  %s2339_s6 = inlined_call_operand.hbm [shape: f32[512,1], index: 6, kind: input, shape index: {}]   ;;  %s2340_s7 = inlined_call_operand.<no memory space> [shape: f32[1,1], index: 7, kind: input, shape index: {}]   ;;  %s2341_s8 = inlined_call_operand.vmem [shape: f32[8,1], index: 8, kind: output, shape index: {}]  }
   0x1   :  { %v13_v0 = vstv %s2340_s7 }
   0x2   :  { %14 = vst [vmem:[#allocation2] sm:$0x1] %v13_v0 }
   0x3   :  { %15 = vsyncpa [#allocation4], 0 }
   0x4   :  { %16 = vsyncpa [#allocation6], 0  ;;  %s1767_s29 = smov [#allocation3]  }
   0x5   :  { %s32_s30 = sshll.u32 %s1767_s29, 4  ;;  %s33_s30 = int_to_ptr.vmem [resolvable:$true] %s32_s30 }
   0x6   :  { %s1731_s9 = scalar_lea.vmem %s33_s30, 2048  ;;  %p1736_p1 = scmp.lt.s32.totalorder %s33_s30, %s33_s30 }
   0x7   :  { %p1732_p0 = scmp.ne.s32.totalorder %s33_s30, %s1731_s9  ;;  %p1737_p2 = scmp.lt.s32.totalorder %s1731_s9, %s1731_s9 }
   0x9   :  { %p1738_p3 = por %p1737_p2, %p1736_p1 }
   0xb   :  { %p1739_p4 = pnand %p1738_p3, %p1732_p0 }
   0xd   :  { %1742 = shalt.err (!%p1739_p4)
}
   0xe   :  { %s1768_s10 = smov 256   ;;  %s1769_s11 = smov 16  }
   0xf   :  { %38 = dma.hbm_to_vmem [thread:$0]  %s2338_s5, 2048, %s33_s30, [#allocation4], %s1768_s10, %s1768_s10, %s1769_s11  }
  0x10   :  { %s1770_s7 = smov [#allocation5]  }
  0x11   :  { %s44_s14 = sshll.u32 %s1770_s7, 4  ;;  %s45_s14 = int_to_ptr.vmem [resolvable:$true] %s44_s14 }
  0x12   :  { %s1751_s15 = scalar_lea.vmem %s45_s14, 8192  ;;  %p1756_p6 = scmp.lt.s32.totalorder %s45_s14, %s45_s14 }
  0x13   :  { %p1752_p5 = scmp.ne.s32.totalorder %s45_s14, %s1751_s15  ;;  %p1757_p7 = scmp.lt.s32.totalorder %s1751_s15, %s1751_s15 }
  0x15   :  { %p1758_p8 = por %p1757_p7, %p1756_p6 }
  0x17   :  { %p1759_p9 = pnand %p1758_p8, %p1752_p5 }
  0x19   :  { %1762 = shalt.err (!%p1759_p9)
}
  0x1a   :  { %s1771_s16 = smov 128   ;;  %s1772_s17 = smov 8  }
  0x1b   :  { %50 = dma.hbm_to_vmem [thread:$0]  %s2339_s6, 8192, %s45_s14, [#allocation6], %s1771_s16, %s1771_s16, %s1772_s17  }
  0x1c   :  { %1763 = dma.done.wait [#allocation4], 2048  }
  0x1d   :  { %1764 = vsyncadd [#allocation4], 4294965248 }
  0x1e   :  { %1765 = dma.done.wait [#allocation6], 8192  }
  0x1f   :  { %1766 = vsyncadd [#allocation6], 4294959104  ;;  %vm100_vm0 = vcmask 1043456   ;;  %vm75_vm1 = vcmask 31744   ;;  %v67_v1 = vld [vmem:[%s2334_s1] sm:$0xf]  ;;  %v219_v52 = vlaneseq }
  0x20   :  { %v59_v2 = vld [vmem:[%s2333_s0] sm:$0xff]  ;;  %v60_v3 = vld [vmem:[%s2333_s0 + $0x8] sm:$0xff]  ;;  %1605 = vmatprep.subr.msk.mxu0 %vm100_vm0, %v67_v1  ;;  %v61_v4 = vld [vmem:[%s2333_s0 + $0x10] sm:$0xff]  ;;  %v1773_v18 = vmov 0.0   ;;  %vm229_vm2 = vcmask 261120   ;;  %vm434_vm6 = vcmask 523264  }
  0x21   :  { %1607 = vmatprep.mubr.msk.f32.mxu0 %vm75_vm1, %v59_v2  ;;  %1606 = vmatpush3.msk.msra.mxu0 %vm100_vm0, %v67_v1  ;;  %v216_v5 = vld [vmem:[%s2336_s3 + $0x38] sm:$0xff]  ;;  %v215_v6 = vld [vmem:[%s2336_s3 + $0x30] sm:$0xff]  ;;  %v214_v7 = vld [vmem:[%s2336_s3 + $0x28] sm:$0xff]  ;;  %v220_v53 = vshrl.u32 %v219_v52, 7  ;;  %v368_v0 = vand.u32 127, %v219_v52  ;;  %vm1476_vm7 = vcmask 7168  }
  0x22   :  { %1608 = vmatmul.mubr.msk.f32.vlgmr.msra.gmra.mxu0 %vm75_vm1, %v60_v3  ;;  %v62_v8 = vld [vmem:[%s2333_s0 + $0x18] sm:$0xff]  ;;  %278 = vmatprep.subr.mxu1 %v216_v5  ;;  %v63_v9 = vld [vmem:[%s2333_s0 + $0x20] sm:$0xff]  ;;  %v64_v10 = vld [vmem:[%s2333_s0 + $0x28] sm:$0xff] }
  0x23   :  { %1610 = vmatprep.mubr.msk.f32.mxu0 %vm75_vm1, %v61_v4  ;;  %279 = vmatpush1.msra.mxu1 %v215_v6  ;;  %v65_v11 = vld [vmem:[%s2333_s0 + $0x30] sm:$0xff]  ;;  %v66_v12 = vld [vmem:[%s2333_s0 + $0x38] sm:$0xff]  ;;  %v213_v13 = vld [vmem:[%s2336_s3 + $0x20] sm:$0xff]  ;;  %v221_v54 = vsub.s32 0, %v220_v53  ;;  %v225_v57 = vsub.s32 1, %v220_v53  ;;  %v2002_v5 = vadd.s32 128, %v368_v0 }
  0x24   :  { %280 = vmatprep.subr.mxu1 %v214_v7  ;;  %v212_v14 = vld [vmem:[%s2336_s3 + $0x18] sm:$0xff]  ;;  %v211_v15 = vld [vmem:[%s2336_s3 + $0x10] sm:$0xff]  ;;  %v210_v16 = vld [vmem:[%s2336_s3 + $0x8] sm:$0xff]  ;;  %318 = vmatprep.mubr.f32.mxu1 %v1773_v18 }
  0x25   :  { %281 = vmatpush1.msra.mxu1 %v213_v13  ;;  %v209_v17 = vld [vmem:[%s2336_s3] sm:$0xff]  ;;  %v1892_v20 = vld [vmem:[#allocation3 + $0x70] sm:$0xff]  ;;  %v1895_v21 = vld [vmem:[#allocation3 + $0x68] sm:$0xff]  ;;  %vm399_vm5 = vcmp.lt.s32.totalorder %v2002_v5, 192 }
  0x26   :  { %1611 = vmatmul.mubr.msk.f32.gmra.mxu0 %vm75_vm1, %v62_v8  ;;  %282 = vmatprep.subr.mxu1 %v212_v14  ;;  %v1890_v19 = vld [vmem:[#allocation3 + $0x78] sm:$0xff]  ;;  %v1900_v22 = vld [vmem:[#allocation3 + $0x60] sm:$0xff]  ;;  %v1905_v24 = vld [vmem:[#allocation3 + $0x50] sm:$0xff]  ;;  %v374_v8 = vand.u32 63, %v368_v0 }
  0x27   :  { %1613 = vmatprep.mubr.msk.f32.mxu0 %vm75_vm1, %v63_v9  ;;  %283 = vmatpush1.msra.mxu1 %v211_v15  ;;  %v1903_v23 = vld [vmem:[#allocation3 + $0x58] sm:$0xff]  ;;  %v1908_v25 = vld [vmem:[#allocation3 + $0x48] sm:$0xff]  ;;  %v1912_v26 = vld [vmem:[#allocation3 + $0x40] sm:$0xff] }
  0x28   :  { %284 = vmatprep.subr.mxu1 %v210_v16  ;;  %454 = vmatprep.subr.mxu0 %v1890_v19  ;;  %v1915_v27 = vld [vmem:[#allocation3 + $0x38] sm:$0xff]  ;;  %v1917_v28 = vld [vmem:[#allocation3 + $0x30] sm:$0xff]  ;;  %v1920_v29 = vld [vmem:[#allocation3 + $0x28] sm:$0xff]  ;;  %vm2011_vm3 = vcmp.ge.s32.totalorder %v374_v8, 32 }
  0x29   :  { %285 = vmatpush1.msra.mxu1 %v209_v17  ;;  %455 = vmatpush1.msra.mxu0 %v1892_v20  ;;  %v1924_v30 = vld [vmem:[#allocation3 + $0x20] sm:$0xff]  ;;  %v1927_v31 = vld [vmem:[#allocation3 + $0x18] sm:$0xff]  ;;  %v1929_v32 = vld [vmem:[#allocation3 + $0x10] sm:$0xff] }
  0x2a   :  { %1614 = vmatmul.mubr.msk.f32.gmra.mxu0 %vm75_vm1, %v64_v10  ;;  %660 = vmatprep.subr.mxu1 %v1890_v19  ;;  %v1932_v33 = vld [vmem:[#allocation3 + $0x8] sm:$0xff]  ;;  %v1936_v34 = vld [vmem:[#allocation3] sm:$0xff]  ;;  %v1484_v36 = vld [vmem:[%s2335_s2] ss:$0 sm:$0xff] }
  0x2b   :  { %1616 = vmatprep.mubr.msk.f32.mxu0 %vm75_vm1, %v65_v11  ;;  %456 = vmatprep.subr.mxu0 %v1895_v21  ;;  %v217_v55 = vld [vmem:[%s2337_s4] sm:$0x3]  ;;  %v381_v11 = vand.u32 63, %v2002_v5  ;;  %s1774_s4 = smov 64   ;;  %v1322_v14 = vld [vmem:[#allocation5 + $0x1c8] sm:$0xff] }
  0x2c   :  { %457 = vmatpush1.msra.mxu0 %v1900_v22  ;;  %v222_v59 = vrot.slane %v217_v55, %v221_v54  ;;  %v226_v61 = vrot.slane %v217_v55, %v225_v57  ;;  %v1305_v17 = vld [vmem:[#allocation5 + $0x140] sm:$0xff] }
  0x2d   :  { %458 = vmatprep.subr.mxu0 %v1903_v23  ;;  %vm2017_vm4 = vcmp.ge.s32.totalorder %v381_v11, 32  ;;  %v1297_v5 = vld [vmem:[#allocation5 + $0x100] sm:$0xff] }
  0x2e   :  { %1617 = vmatmul.mubr.msk.f32.gmra.mxu0 %vm75_vm1, %v66_v12 }
  0x2f   :  { %502 = vmatprep.mubr.f32.mxu0 %v1773_v18  ;;  %459 = vmatpush1.msra.mxu0 %v1905_v24 }
  0x30   :  { %460 = vmatprep.subr.mxu0 %v1908_v25 }
  0x31   :  { %461 = vmatpush1.msra.mxu0 %v1912_v26 }
  0x32   :  { %462 = vmatprep.subr.mxu0 %v1915_v27 }
  0x33   :  { %463 = vmatpush1.msra.mxu0 %v1917_v28 }
  0x34   :  { %464 = vmatprep.subr.mxu0 %v1920_v29 }
  0x35   :  { %465 = vmatpush1.msra.mxu0 %v1924_v30 }
  0x36   :  { %466 = vmatprep.subr.mxu0 %v1927_v31 }
  0x37   :  { %467 = vmatpush1.msra.mxu0 %v1929_v32 }
  0x38   :  { %468 = vmatprep.subr.mxu0 %v1932_v33 }
  0x39   :  { %469 = vmatpush1.msra.mxu0 %v1936_v34 }
  0x3a   :  { %503 = vmatmul.mubr.f32.vlgmr.msra.gmra.mxu0 %v1773_v18  ;;  %557 = vmatprep.subr.mxu0 %v1890_v19 }
  0x3b   :  { %558 = vmatpush1.msra.mxu0 %v1892_v20  ;;  %605 = vmatprep.mubr.f32.mxu0 %v1773_v18 }
  0x3c   :  { %559 = vmatprep.subr.mxu0 %v1895_v21 }
  0x3d   :  { %560 = vmatpush1.msra.mxu0 %v1900_v22 }
  0x3e   :  { %561 = vmatprep.subr.mxu0 %v1903_v23 }
  0x3f   :  { %562 = vmatpush1.msra.mxu0 %v1905_v24 }
  0x40   :  { %563 = vmatprep.subr.mxu0 %v1908_v25 }
  0x41   :  { %564 = vmatpush1.msra.mxu0 %v1912_v26 }
  0x42   :  { %565 = vmatprep.subr.mxu0 %v1915_v27 }
  0x43   :  { %566 = vmatpush1.msra.mxu0 %v1917_v28 }
  0x44   :  { %567 = vmatprep.subr.mxu0 %v1920_v29 }
  0x45   :  { %568 = vmatpush1.msra.mxu0 %v1924_v30 }
  0x46   :  { %569 = vmatprep.subr.mxu0 %v1927_v31 }
  0x47   :  { %570 = vmatpush1.msra.mxu0 %v1929_v32 }
  0x48   :  { %571 = vmatprep.subr.mxu0 %v1932_v33 }
  0x49   :  { %572 = vmatpush1.msra.mxu0 %v1936_v34 }
  0x4a   :  { %763 = vmatprep.subr.mxu0 %v1890_v19 }
  0xe2   :  { %v1609_v35 = vpop.f32.mrf.mxu0 }
  0xe3   :  { %v176_v40 = vadd.f32 %v1609_v35, %v1484_v36 }
  0xe4   :  { %v170_v37 = vpop.f32.mrf.mxu0 }
  0xe5   :  { %v171_v38 = vadd.f32 %v1484_v36, %v170_v37 }
  0xe6   :  { %v1612_v39 = vpop.f32.mrf.mxu0 }
  0xe7   :  { %1494 = vmatmul.mubr.msk.f32.vlgmr.msra.gmra.mxu1 %vm229_vm2, %v171_v38  ;;  %v186_v44 = vadd.f32 %v1612_v39, %v1484_v36 }
  0xe8   :  { %324 = vmatprep.mubr.f32.mxu1 %v1773_v18  ;;  %661 = vmatpush1.msra.mxu1 %v1892_v20  ;;  %v180_v41 = vpop.f32.mrf.mxu0 }
  0xe9   :  { %662 = vmatprep.subr.mxu1 %v1895_v21  ;;  %v181_v42 = vadd.f32 %v1484_v36, %v180_v41 }
  0xea   :  { %663 = vmatpush1.msra.mxu1 %v1900_v22  ;;  %v1615_v43 = vpop.f32.mrf.mxu0 }
  0xeb   :  { %1495 = vmatmul.mubr.msk.f32.gmra.mxu1 %vm229_vm2, %v176_v40  ;;  %664 = vmatprep.subr.mxu1 %v1903_v23  ;;  %v196_v48 = vadd.f32 %v1615_v43, %v1484_v36 }
  0xec   :  { %330 = vmatprep.mubr.f32.mxu1 %v1773_v18  ;;  %665 = vmatpush1.msra.mxu1 %v1905_v24  ;;  %v190_v45 = vpop.f32.mrf.mxu0 }
  0xed   :  { %666 = vmatprep.subr.mxu1 %v1908_v25  ;;  %v191_v46 = vadd.f32 %v1484_v36, %v190_v45 }
  0xee   :  { %667 = vmatpush1.msra.mxu1 %v1912_v26  ;;  %v1618_v47 = vpop.f32.mrf.mxu0 }
  0xef   :  { %1496 = vmatmul.mubr.msk.f32.gmra.mxu1 %vm229_vm2, %v181_v42  ;;  %668 = vmatprep.subr.mxu1 %v1915_v27  ;;  %v206_v51 = vadd.f32 %v1618_v47, %v1484_v36 }
  0xf0   :  { %336 = vmatprep.mubr.f32.mxu1 %v1773_v18  ;;  %669 = vmatpush1.msra.mxu1 %v1917_v28  ;;  %v200_v49 = vpop.f32.mrf.mxu0 }
  0xf1   :  { %670 = vmatprep.subr.mxu1 %v1920_v29  ;;  %v201_v50 = vadd.f32 %v1484_v36, %v200_v49 }
  0xf2   :  { %671 = vmatpush1.msra.mxu1 %v1924_v30 }
  0xf3   :  { %1497 = vmatmul.mubr.msk.f32.gmra.mxu1 %vm229_vm2, %v186_v44  ;;  %672 = vmatprep.subr.mxu1 %v1927_v31 }
  0xf4   :  { %342 = vmatprep.mubr.f32.mxu1 %v1773_v18  ;;  %673 = vmatpush1.msra.mxu1 %v1929_v32 }
  0xf5   :  { %674 = vmatprep.subr.mxu1 %v1932_v33 }
  0xf6   :  { %675 = vmatpush1.msra.mxu1 %v1936_v34 }
  0xf7   :  { %1498 = vmatmul.mubr.msk.f32.gmra.mxu1 %vm229_vm2, %v191_v46  ;;  %866 = vmatprep.subr.mxu1 %v1890_v19 }
  0xf8   :  { %348 = vmatprep.mubr.f32.mxu1 %v1773_v18 }
  0xfb   :  { %1499 = vmatmul.mubr.msk.f32.gmra.mxu1 %vm229_vm2, %v196_v48 }
  0xfc   :  { %354 = vmatprep.mubr.f32.mxu1 %v1773_v18 }
  0xff   :  { %1500 = vmatmul.mubr.msk.f32.gmra.mxu1 %vm229_vm2, %v201_v50 }
 0x100   :  { %360 = vmatprep.mubr.f32.mxu1 %v1773_v18 }
 0x103   :  { %1501 = vmatmul.mubr.msk.f32.gmra.mxu1 %vm229_vm2, %v206_v51 }
 0x104   :  { %708 = vmatprep.mubr.f32.mxu1 %v1773_v18 }
 0x1a7   :  { %v320_v56 = vpop.f32.mrf.mxu1 }
 0x1a8   :  { %v2071_v55 = vadd.f32 %v320_v56, %v222_v59 }
 0x1a9   :  { %v322_v58 = vpop.f32.mrf.mxu1 }
 0x1ab   :  { %v326_v60 = vpop.f32.mrf.mxu1 }
 0x1ac   :  { %v1996_v62 = vadd.f32 %v326_v60, %v222_v59  ;;  %v504_v60 = vpop.f32.mrf.mxu0 }
 0x1ad   :  { %v328_v63 = vpop.f32.mrf.mxu1 }
 0x1ae   :  { %v1998_v1 = vadd.f32 %v328_v63, %v226_v61 }
 0x1af   :  { %v332_v2 = vpop.f32.mrf.mxu1 }
 0x1b0   :  { %v2000_v3 = vadd.f32 %v332_v2, %v222_v59 }
 0x1b1   :  { %v334_v4 = vpop.f32.mrf.mxu1 }
 0x1b2   :  { %v2004_v6 = vadd.f32 %v334_v4, %v226_v61  ;;  %v2083_v4 = vadd.f32 %v322_v58, %v226_v61  ;;  %v506_v58 = vpop.f32.mrf.mxu0 }
 0x1b3   :  { %v338_v7 = vpop.f32.mrf.mxu1 }
 0x1b4   :  { %v2006_v9 = vadd.f32 %v338_v7, %v222_v59 }
 0x1b5   :  { %v340_v10 = vpop.f32.mrf.mxu1 }
 0x1b6   :  { %v2009_v12 = vadd.f32 %v340_v10, %v226_v61 }
 0x1b7   :  { %v344_v13 = vpop.f32.mrf.mxu1 }
 0x1b8   :  { %v2015_v15 = vadd.f32 %v344_v13, %v222_v59 }
 0x1b9   :  { %v346_v16 = vpop.f32.mrf.mxu1 }
 0x1ba   :  { %v2021_v35 = vadd.f32 %v346_v16, %v226_v61  ;;  %v408_v36 = vsel %vm2011_vm3, %v2015_v15, %v2006_v9  ;;  %v410_v37 = vsel %vm2011_vm3, %v2006_v9, %v2015_v15 }
 0x1bb   :  { %v350_v38 = vpop.f32.mrf.mxu1 }
 0x1bc   :  { %v2031_v39 = vadd.f32 %v350_v38, %v222_v59  ;;  %v409_v40 = vsel %vm2017_vm4, %v2021_v35, %v2009_v12  ;;  %v411_v41 = vsel %vm2017_vm4, %v2009_v12, %v2021_v35 }
 0x1bd   :  { %v352_v42 = vpop.f32.mrf.mxu1 }
 0x1be   :  { %v2041_v43 = vadd.f32 %v352_v42, %v226_v61  ;;  %v406_v44 = vsel %vm2011_vm3, %v2031_v39, %v2000_v3  ;;  %v412_v45 = vsel %vm2011_vm3, %v2000_v3, %v2031_v39 }
 0x1bf   :  { %v356_v46 = vpop.f32.mrf.mxu1 }
 0x1c0   :  { %v2051_v47 = vadd.f32 %v356_v46, %v222_v59  ;;  %v407_v48 = vsel %vm2017_vm4, %v2041_v43, %v2004_v6  ;;  %v413_v49 = vsel %vm2017_vm4, %v2004_v6, %v2041_v43 }
 0x1c1   :  { %v358_v50 = vpop.f32.mrf.mxu1 }
 0x1c2   :  { %v2061_v51 = vadd.f32 %v358_v50, %v226_v61  ;;  %v404_v52 = vsel %vm2011_vm3, %v2051_v47, %v1996_v62  ;;  %v414_v53 = vsel %vm2011_vm3, %v1996_v62, %v2051_v47 }
 0x1c3   :  { %v362_v54 = vpop.f32.mrf.mxu1 }
 0x1c4   :  { %v2073_v57 = vadd.f32 %v362_v54, %v222_v59  ;;  %v405_v63 = vsel %vm2017_vm4, %v2061_v51, %v1998_v1  ;;  %v415_v0 = vsel %vm2017_vm4, %v1998_v1, %v2061_v51 }
 0x1c5   :  { %v364_v2 = vpop.f32.mrf.mxu1 }
 0x1c6   :  { %v402_v56 = vsel %vm2011_vm3, %v2073_v57, %v2071_v55  ;;  %v2089_v59 = vadd.f32 %v364_v2, %v226_v61 }
 0x1c7   :  { %v509_v8 = vadd.f32 %v504_v60, %v402_v56 }
 0x1c8   :  { %v403_v10 = vsel %vm2017_vm4, %v2089_v59, %v2083_v4 }
 0x1c9   :  { %v1502_v13 = vmul.f32 -1.442695, %v509_v8  ;;  %v510_v61 = vadd.f32 %v506_v58, %v403_v10 }
 0x1cb   :  { %1627 = vpow2.f32 %v1502_v13  ;;  %v1503_v16 = vmul.f32 -1.442695, %v510_v61 }
 0x1cd   :  { %1629 = vpow2.f32 %v1503_v16 }
 0x1ce   :  { %1631 = vtanh.f32 %v510_v61 }
 0x1d8   :  { %v1628_v38 = vpop.eup %1627 }
 0x1d9   :  { %v519_v46 = vadd.f32 1.0, %v1628_v38 }
 0x1da   :  { %v1630_v42 = vpop.eup %1629 }
 0x1db   :  { %v520_v50 = vadd.f32 1.0, %v1630_v42  ;;  %v1632_v54 = vpop.eup %1631 }
 0x1dd   :  { %1633 = vrcp.f32 %v520_v50 }
 0x1de   :  { %1635 = vrcp.f32 %v519_v46 }
 0x1ea   :  { %v1634_v60 = vpop.eup %1633 }
 0x1eb   :  { %v1636_v2 = vpop.eup %1635  ;;  %v526_v56 = vsel %vm399_vm5, %v1632_v54, %v1634_v60 }
 0x1ec   :  { %v528_v8 = vmul.f32 %v1636_v2, %v526_v56  ;;  %v527_v10 = vmul.f32 0.0, %v1636_v2 }
 0x1ee   :  { %530 = vrot.lane.b32.xlu0 %v528_v8, %s1774_s4 }
 0x260   :  { %v531_v58 = vpop.permute.xlu0 %530 }
 0x261   :  { %v533_v13 = vadd.f32 %v531_v58, %v527_v10 }
 0x263   :  { %1637 = vtanh.f32 %v533_v13 }
 0x270   :  { %v1638_v16 = vpop.eup %1637 }
 0x271   :  { %v535_v61 = vmul.f32 %v1638_v16, %v526_v56 }
 0x273   :  { %537 = vrot.lane.b32.xlu0 %v535_v61, %s1774_s4 }
 0x2e5   :  { %v2108_v38 = vpop.permute.xlu0 %537 }
 0x2e6   :  { %1504 = vmatmul.mubr.msk.f32.vlgmr.msra.gmra.mxu0 %vm434_vm6, %v2108_v38 }
 0x2e7   :  { %764 = vmatpush1.msra.mxu0 %v1892_v20  ;;  %811 = vmatprep.mubr.f32.mxu0 %v1773_v18 }
 0x2e8   :  { %765 = vmatprep.subr.mxu0 %v1895_v21 }
 0x2e9   :  { %766 = vmatpush1.msra.mxu0 %v1900_v22 }
 0x2ea   :  { %767 = vmatprep.subr.mxu0 %v1903_v23 }
 0x2eb   :  { %768 = vmatpush1.msra.mxu0 %v1905_v24 }
 0x2ec   :  { %769 = vmatprep.subr.mxu0 %v1908_v25 }
 0x2ed   :  { %770 = vmatpush1.msra.mxu0 %v1912_v26 }
 0x2ee   :  { %771 = vmatprep.subr.mxu0 %v1915_v27 }
 0x2ef   :  { %772 = vmatpush1.msra.mxu0 %v1917_v28 }
 0x2f0   :  { %773 = vmatprep.subr.mxu0 %v1920_v29 }
 0x2f1   :  { %774 = vmatpush1.msra.mxu0 %v1924_v30 }
 0x2f2   :  { %775 = vmatprep.subr.mxu0 %v1927_v31 }
 0x2f3   :  { %776 = vmatpush1.msra.mxu0 %v1929_v32 }
 0x2f4   :  { %777 = vmatprep.subr.mxu0 %v1932_v33 }
 0x2f5   :  { %778 = vmatpush1.msra.mxu0 %v1936_v34 }
 0x2f6   :  { %969 = vmatprep.subr.mxu0 %v1890_v19 }
 0x3a6   :  { %v607_v42 = vpop.f32.mrf.mxu0 }
 0x3a7   :  { %v612_v46 = vadd.f32 %v607_v42, %v404_v52 }
 0x3a8   :  { %v609_v50 = vpop.f32.mrf.mxu0 }
 0x3a9   :  { %v1505_v54 = vmul.f32 -1.442695, %v612_v46  ;;  %v613_v60 = vadd.f32 %v609_v50, %v405_v63 }
 0x3ab   :  { %1639 = vpow2.f32 %v1505_v54  ;;  %v1506_v2 = vmul.f32 -1.442695, %v613_v60 }
 0x3ad   :  { %1641 = vpow2.f32 %v1506_v2 }
 0x3ae   :  { %1643 = vtanh.f32 %v613_v60 }
 0x3b8   :  { %v1640_v56 = vpop.eup %1639 }
 0x3b9   :  { %v622_v10 = vadd.f32 1.0, %v1640_v56 }
 0x3ba   :  { %v1642_v8 = vpop.eup %1641 }
 0x3bb   :  { %v623_v58 = vadd.f32 1.0, %v1642_v8  ;;  %v1644_v16 = vpop.eup %1643 }
 0x3bd   :  { %1645 = vrcp.f32 %v623_v58 }
 0x3be   :  { %1647 = vrcp.f32 %v622_v10 }
 0x3ca   :  { %v1646_v61 = vpop.eup %1645 }
 0x3cb   :  { %v1648_v11 = vpop.eup %1647  ;;  %v629_v7 = vsel %vm399_vm5, %v1644_v16, %v1646_v61 }
 0x3cc   :  { %v631_v52 = vmul.f32 %v1648_v11, %v629_v7  ;;  %v630_v63 = vmul.f32 %v1648_v11, %v533_v13 }
 0x3ce   :  { %633 = vrot.lane.b32.xlu1 %v631_v52, %s1774_s4 }
 0x440   :  { %v634_v42 = vpop.permute.xlu1 %633 }
 0x441   :  { %v636_v46 = vadd.f32 %v634_v42, %v630_v63 }
 0x443   :  { %1649 = vtanh.f32 %v636_v46 }
 0x450   :  { %v1650_v50 = vpop.eup %1649 }
 0x451   :  { %v2137_v54 = vmul.f32 %v1650_v50, %v629_v7 }
 0x453   :  { %640 = vrot.lane.b32.xlu1 %v2137_v54, %s1774_s4 }
 0x4c5   :  { %v641_v60 = vpop.permute.xlu1 %640 }
 0x4c6   :  { %1507 = vmatmul.mubr.msk.f32.vlgmr.msra.gmra.mxu1 %vm434_vm6, %v641_v60 }
 0x4c7   :  { %867 = vmatpush1.msra.mxu1 %v1892_v20  ;;  %914 = vmatprep.mubr.f32.mxu1 %v1773_v18 }
 0x4c8   :  { %868 = vmatprep.subr.mxu1 %v1895_v21 }
 0x4c9   :  { %869 = vmatpush1.msra.mxu1 %v1900_v22 }
 0x4ca   :  { %870 = vmatprep.subr.mxu1 %v1903_v23 }
 0x4cb   :  { %871 = vmatpush1.msra.mxu1 %v1905_v24 }
 0x4cc   :  { %872 = vmatprep.subr.mxu1 %v1908_v25 }
 0x4cd   :  { %873 = vmatpush1.msra.mxu1 %v1912_v26 }
 0x4ce   :  { %874 = vmatprep.subr.mxu1 %v1915_v27 }
 0x4cf   :  { %875 = vmatpush1.msra.mxu1 %v1917_v28 }
 0x4d0   :  { %876 = vmatprep.subr.mxu1 %v1920_v29 }
 0x4d1   :  { %877 = vmatpush1.msra.mxu1 %v1924_v30 }
 0x4d2   :  { %878 = vmatprep.subr.mxu1 %v1927_v31 }
 0x4d3   :  { %879 = vmatpush1.msra.mxu1 %v1929_v32 }
 0x4d4   :  { %880 = vmatprep.subr.mxu1 %v1932_v33 }
 0x4d5   :  { %881 = vmatpush1.msra.mxu1 %v1936_v34 }
 0x4d6   :  { %1072 = vmatprep.subr.mxu1 %v1890_v19 }
 0x586   :  { %v710_v7 = vpop.f32.mrf.mxu1 }
 0x587   :  { %v715_v11 = vadd.f32 %v710_v7, %v406_v44 }
 0x588   :  { %v712_v13 = vpop.f32.mrf.mxu1 }
 0x589   :  { %v1508_v2 = vmul.f32 -1.442695, %v715_v11  ;;  %v716_v56 = vadd.f32 %v712_v13, %v407_v48 }
 0x58b   :  { %1651 = vpow2.f32 %v1508_v2  ;;  %v1509_v8 = vmul.f32 -1.442695, %v716_v56 }
 0x58d   :  { %1653 = vpow2.f32 %v1509_v8 }
 0x58e   :  { %1655 = vtanh.f32 %v716_v56 }
 0x598   :  { %v1652_v10 = vpop.eup %1651 }
 0x599   :  { %v725_v16 = vadd.f32 1.0, %v1652_v10 }
 0x59a   :  { %v1654_v58 = vpop.eup %1653 }
 0x59b   :  { %v726_v61 = vadd.f32 1.0, %v1654_v58  ;;  %v1656_v52 = vpop.eup %1655 }
 0x59d   :  { %1657 = vrcp.f32 %v726_v61 }
 0x59e   :  { %1659 = vrcp.f32 %v725_v16 }
 0x5aa   :  { %v1658_v44 = vpop.eup %1657 }
 0x5ab   :  { %v1660_v63 = vpop.eup %1659  ;;  %v732_v42 = vsel %vm399_vm5, %v1656_v52, %v1658_v44 }
 0x5ac   :  { %v734_v50 = vmul.f32 %v1660_v63, %v732_v42  ;;  %v733_v48 = vmul.f32 %v1660_v63, %v636_v46 }
 0x5ae   :  { %736 = vrot.lane.b32.xlu0 %v734_v50, %s1774_s4 }
 0x620   :  { %v737_v60 = vpop.permute.xlu0 %736 }
 0x621   :  { %v739_v7 = vadd.f32 %v737_v60, %v733_v48 }
 0x623   :  { %1661 = vtanh.f32 %v739_v7 }
 0x630   :  { %v1662_v11 = vpop.eup %1661 }
 0x631   :  { %v741_v13 = vmul.f32 %v1662_v11, %v732_v42 }
 0x633   :  { %743 = vrot.lane.b32.xlu1 %v741_v13, %s1774_s4 }
 0x6a5   :  { %v2173_v2 = vpop.permute.xlu1 %743 }
 0x6a6   :  { %1510 = vmatmul.mubr.msk.f32.vlgmr.msra.gmra.mxu0 %vm434_vm6, %v2173_v2 }
 0x6a7   :  { %970 = vmatpush1.msra.mxu0 %v1892_v20  ;;  %1017 = vmatprep.mubr.f32.mxu0 %v1773_v18 }
 0x6a8   :  { %971 = vmatprep.subr.mxu0 %v1895_v21 }
 0x6a9   :  { %972 = vmatpush1.msra.mxu0 %v1900_v22 }
 0x6aa   :  { %973 = vmatprep.subr.mxu0 %v1903_v23 }
 0x6ab   :  { %974 = vmatpush1.msra.mxu0 %v1905_v24 }
 0x6ac   :  { %975 = vmatprep.subr.mxu0 %v1908_v25 }
 0x6ad   :  { %976 = vmatpush1.msra.mxu0 %v1912_v26 }
 0x6ae   :  { %977 = vmatprep.subr.mxu0 %v1915_v27 }
 0x6af   :  { %978 = vmatpush1.msra.mxu0 %v1917_v28 }
 0x6b0   :  { %979 = vmatprep.subr.mxu0 %v1920_v29 }
 0x6b1   :  { %980 = vmatpush1.msra.mxu0 %v1924_v30 }
 0x6b2   :  { %981 = vmatprep.subr.mxu0 %v1927_v31 }
 0x6b3   :  { %982 = vmatpush1.msra.mxu0 %v1929_v32 }
 0x6b4   :  { %983 = vmatprep.subr.mxu0 %v1932_v33 }
 0x6b5   :  { %984 = vmatpush1.msra.mxu0 %v1936_v34 }
 0x6b6   :  { %1175 = vmatprep.subr.mxu0 %v1890_v19 }
 0x766   :  { %v813_v46 = vpop.f32.mrf.mxu0 }
 0x767   :  { %v818_v56 = vadd.f32 %v813_v46, %v408_v36 }
 0x768   :  { %v815_v8 = vpop.f32.mrf.mxu0 }
 0x769   :  { %v1511_v10 = vmul.f32 -1.442695, %v818_v56  ;;  %v819_v58 = vadd.f32 %v815_v8, %v409_v40 }
 0x76b   :  { %1663 = vpow2.f32 %v1511_v10  ;;  %v1512_v16 = vmul.f32 -1.442695, %v819_v58 }
 0x76d   :  { %1665 = vpow2.f32 %v1512_v16 }
 0x76e   :  { %1667 = vtanh.f32 %v819_v58 }
 0x778   :  { %v1664_v61 = vpop.eup %1663 }
 0x779   :  { %v828_v52 = vadd.f32 1.0, %v1664_v61 }
 0x77a   :  { %v1666_v19 = vpop.eup %1665 }
 0x77b   :  { %v829_v44 = vadd.f32 1.0, %v1666_v19  ;;  %v1668_v63 = vpop.eup %1667 }
 0x77d   :  { %1669 = vrcp.f32 %v829_v44 }
 0x77e   :  { %1671 = vrcp.f32 %v828_v52 }
 0x78a   :  { %v1670_v36 = vpop.eup %1669 }
 0x78b   :  { %v1672_v42 = vpop.eup %1671  ;;  %v835_v50 = vsel %vm399_vm5, %v1668_v63, %v1670_v36 }
 0x78c   :  { %v837_v48 = vmul.f32 %v1672_v42, %v835_v50  ;;  %v836_v40 = vmul.f32 %v1672_v42, %v739_v7 }
 0x78e   :  { %839 = vrot.lane.b32.xlu0 %v837_v48, %s1774_s4 }
 0x800   :  { %v840_v60 = vpop.permute.xlu0 %839 }
 0x801   :  { %v842_v11 = vadd.f32 %v840_v60, %v836_v40 }
 0x803   :  { %1673 = vtanh.f32 %v842_v11 }
 0x810   :  { %v1674_v13 = vpop.eup %1673 }
 0x811   :  { %v2207_v46 = vmul.f32 %v1674_v13, %v835_v50 }
 0x813   :  { %846 = vrot.lane.b32.xlu1 %v2207_v46, %s1774_s4  ;;  %v1262_v13 = vsel %vm434_vm6, %v2173_v2, %v2207_v46  ;;  %v1290_v2 = vld [vmem:[#allocation5 + $0xc8] sm:$0xff] }
 0x814   :  { %v1274_v46 = vld [vmem:[#allocation5 + $0x48] sm:$0xff] }
 0x885   :  { %v847_v56 = vpop.permute.xlu1 %846 }
 0x886   :  { %1513 = vmatmul.mubr.msk.f32.vlgmr.msra.gmra.mxu1 %vm434_vm6, %v847_v56  ;;  %v1279_v56 = vld [vmem:[#allocation5 + $0x70] sm:$0xff] }
 0x887   :  { %1073 = vmatpush1.msra.mxu1 %v1892_v20  ;;  %1120 = vmatprep.mubr.f32.mxu1 %v1773_v18 }
 0x888   :  { %1074 = vmatprep.subr.mxu1 %v1895_v21 }
 0x889   :  { %1075 = vmatpush1.msra.mxu1 %v1900_v22 }
 0x88a   :  { %1076 = vmatprep.subr.mxu1 %v1903_v23 }
 0x88b   :  { %1077 = vmatpush1.msra.mxu1 %v1905_v24 }
 0x88c   :  { %1078 = vmatprep.subr.mxu1 %v1908_v25 }
 0x88d   :  { %1079 = vmatpush1.msra.mxu1 %v1912_v26 }
 0x88e   :  { %1080 = vmatprep.subr.mxu1 %v1915_v27 }
 0x88f   :  { %1081 = vmatpush1.msra.mxu1 %v1917_v28 }
 0x890   :  { %1082 = vmatprep.subr.mxu1 %v1920_v29 }
 0x891   :  { %1083 = vmatpush1.msra.mxu1 %v1924_v30 }
 0x892   :  { %1084 = vmatprep.subr.mxu1 %v1927_v31 }
 0x893   :  { %1085 = vmatpush1.msra.mxu1 %v1929_v32 }
 0x894   :  { %1086 = vmatprep.subr.mxu1 %v1932_v33 }
 0x895   :  { %1087 = vmatpush1.msra.mxu1 %v1936_v34 }
 0x946   :  { %v916_v7 = vpop.f32.mrf.mxu1 }
 0x947   :  { %v921_v8 = vadd.f32 %v916_v7, %v410_v37  ;;  %v1294_v7 = vld [vmem:[#allocation5 + $0xe8] sm:$0xff] }
 0x948   :  { %v918_v10 = vpop.f32.mrf.mxu1 }
 0x949   :  { %v1514_v58 = vmul.f32 -1.442695, %v921_v8  ;;  %v922_v16 = vadd.f32 %v918_v10, %v411_v41  ;;  %v1278_v8 = vld [vmem:[#allocation5 + $0x68] sm:$0xff]  ;;  %v1293_v10 = vld [vmem:[#allocation5 + $0xe0] sm:$0xff] }
 0x94b   :  { %1675 = vpow2.f32 %v1514_v58  ;;  %v1515_v61 = vmul.f32 -1.442695, %v922_v16  ;;  %v1277_v58 = vld [vmem:[#allocation5 + $0x60] sm:$0xff] }
 0x94d   :  { %1677 = vpow2.f32 %v1515_v61  ;;  %v1276_v61 = vld [vmem:[#allocation5 + $0x58] sm:$0xff] }
 0x94e   :  { %1679 = vtanh.f32 %v922_v16  ;;  %v1292_v16 = vld [vmem:[#allocation5 + $0xd8] sm:$0xff] }
 0x958   :  { %v1676_v19 = vpop.eup %1675 }
 0x959   :  { %v931_v44 = vadd.f32 1.0, %v1676_v19  ;;  %v1291_v19 = vld [vmem:[#allocation5 + $0xd0] sm:$0xff] }
 0x95a   :  { %v1678_v52 = vpop.eup %1677 }
 0x95b   :  { %v932_v63 = vadd.f32 1.0, %v1678_v52  ;;  %v1680_v9 = vpop.eup %1679  ;;  %v1275_v52 = vld [vmem:[#allocation5 + $0x50] sm:$0xff] }
 0x95d   :  { %1681 = vrcp.f32 %v932_v63  ;;  %v1273_v63 = vld [vmem:[#allocation5 + $0x40] sm:$0xff] }
 0x95e   :  { %1683 = vrcp.f32 %v931_v44  ;;  %v1289_v44 = vld [vmem:[#allocation5 + $0xc0] sm:$0xff] }
 0x96a   :  { %v1682_v15 = vpop.eup %1681 }
 0x96b   :  { %v1684_v37 = vpop.eup %1683  ;;  %v938_v36 = vsel %vm399_vm5, %v1680_v9, %v1682_v15  ;;  %v1288_v9 = vld [vmem:[#allocation5 + $0xb8] sm:$0xff] }
 0x96c   :  { %v940_v42 = vmul.f32 %v1684_v37, %v938_v36  ;;  %v939_v12 = vmul.f32 %v1684_v37, %v842_v11  ;;  %v1295_v11 = vld [vmem:[#allocation5 + $0xf0] sm:$0xff]  ;;  %v1272_v15 = vld [vmem:[#allocation5 + $0x38] sm:$0xff] }
 0x96d   :  { %v1287_v37 = vld [vmem:[#allocation5 + $0xb0] sm:$0xff] }
 0x96e   :  { %942 = vrot.lane.b32.xlu0 %v940_v42, %s1774_s4  ;;  %v1286_v42 = vld [vmem:[#allocation5 + $0xa8] sm:$0xff] }
 0x9e0   :  { %v943_v35 = vpop.permute.xlu0 %942 }
 0x9e1   :  { %v945_v41 = vadd.f32 %v943_v35, %v939_v12  ;;  %v1270_v12 = vld [vmem:[#allocation5 + $0x28] sm:$0xff]  ;;  %v1285_v35 = vld [vmem:[#allocation5 + $0xa0] sm:$0xff] }
 0x9e3   :  { %1685 = vtanh.f32 %v945_v41 }
 0x9f0   :  { %v1686_v50 = vpop.eup %1685 }
 0x9f1   :  { %v947_v48 = vmul.f32 %v1686_v50, %v938_v36  ;;  %v1271_v36 = vld [vmem:[#allocation5 + $0x30] sm:$0xff]  ;;  %v1284_v50 = vld [vmem:[#allocation5 + $0x98] sm:$0xff] }
 0x9f3   :  { %949 = vrot.lane.b32.xlu1 %v947_v48, %s1774_s4  ;;  %v1268_v48 = vld [vmem:[#allocation5 + $0x18] sm:$0xff] }
 0xa65   :  { %v2242_v40 = vpop.permute.xlu1 %949 }
 0xa66   :  { %1516 = vmatmul.mubr.msk.f32.vlgmr.msra.gmra.mxu0 %vm434_vm6, %v2242_v40 }
 0xa67   :  { %1176 = vmatpush1.msra.mxu0 %v1892_v20  ;;  %1223 = vmatprep.mubr.f32.mxu0 %v1773_v18 }
 0xa68   :  { %1177 = vmatprep.subr.mxu0 %v1895_v21 }
 0xa69   :  { %1178 = vmatpush1.msra.mxu0 %v1900_v22 }
 0xa6a   :  { %1179 = vmatprep.subr.mxu0 %v1903_v23 }
 0xa6b   :  { %1180 = vmatpush1.msra.mxu0 %v1905_v24 }
 0xa6c   :  { %1181 = vmatprep.subr.mxu0 %v1908_v25 }
 0xa6d   :  { %1182 = vmatpush1.msra.mxu0 %v1912_v26 }
 0xa6e   :  { %1183 = vmatprep.subr.mxu0 %v1915_v27 }
 0xa6f   :  { %1184 = vmatpush1.msra.mxu0 %v1917_v28 }
 0xa70   :  { %1185 = vmatprep.subr.mxu0 %v1920_v29 }
 0xa71   :  { %1186 = vmatpush1.msra.mxu0 %v1924_v30 }
 0xa72   :  { %1187 = vmatprep.subr.mxu0 %v1927_v31 }
 0xa73   :  { %1188 = vmatpush1.msra.mxu0 %v1929_v32 }
 0xa74   :  { %1189 = vmatprep.subr.mxu0 %v1932_v33 }
 0xa75   :  { %1190 = vmatpush1.msra.mxu0 %v1936_v34  ;;  %v1296_v34 = vld [vmem:[#allocation5 + $0xf8] sm:$0xff] }
 0xa76   :  { %1535 = vmatprep.subr.mxu1 %v1296_v34 }
 0xb26   :  { %v1019_v18 = vpop.f32.mrf.mxu0 }
 0xb27   :  { %v1024_v20 = vadd.f32 %v1019_v18, %v412_v45  ;;  %v1283_v18 = vld [vmem:[#allocation5 + $0x90] sm:$0xff] }
 0xb28   :  { %v1021_v21 = vpop.f32.mrf.mxu0 }
 0xb29   :  { %v1517_v22 = vmul.f32 -1.442695, %v1024_v20  ;;  %v1025_v23 = vadd.f32 %v1021_v21, %v413_v49  ;;  %v1280_v49 = vld [vmem:[#allocation5 + $0x78] sm:$0xff]  ;;  %v1267_v20 = vld [vmem:[#allocation5 + $0x10] sm:$0xff]  ;;  %v1282_v21 = vld [vmem:[#allocation5 + $0x88] sm:$0xff] }
 0xb2b   :  { %1687 = vpow2.f32 %v1517_v22  ;;  %v1518_v24 = vmul.f32 -1.442695, %v1025_v23  ;;  %v1266_v22 = vld [vmem:[#allocation5 + $0x8] sm:$0xff] }
 0xb2d   :  { %1689 = vpow2.f32 %v1518_v24  ;;  %v1265_v24 = vld [vmem:[#allocation5] sm:$0xff] }
 0xb2e   :  { %1691 = vtanh.f32 %v1025_v23  ;;  %v1281_v23 = vld [vmem:[#allocation5 + $0x80] sm:$0xff] }
 0xb38   :  { %v1688_v25 = vpop.eup %1687 }
 0xb39   :  { %v1034_v27 = vadd.f32 1.0, %v1688_v25  ;;  %v1261_v25 = vsel %vm434_vm6, %v2108_v38, %v2137_v54 }
 0xb3a   :  { %v1690_v26 = vpop.eup %1689 }
 0xb3b   :  { %v1035_v28 = vadd.f32 1.0, %v1690_v26  ;;  %v1692_v29 = vpop.eup %1691 }
 0xb3d   :  { %1693 = vrcp.f32 %v1035_v28 }
 0xb3e   :  { %1695 = vrcp.f32 %v1034_v27 }
 0xb4a   :  { %v1694_v30 = vpop.eup %1693 }
 0xb4b   :  { %v1696_v31 = vpop.eup %1695  ;;  %v1041_v32 = vsel %vm399_vm5, %v1692_v29, %v1694_v30 }
 0xb4c   :  { %v1043_v33 = vmul.f32 %v1696_v31, %v1041_v32  ;;  %v1042_v3 = vmul.f32 %v1696_v31, %v945_v41  ;;  %v1269_v41 = vld [vmem:[#allocation5 + $0x20] sm:$0xff] }
 0xb4e   :  { %1045 = vrot.lane.b32.xlu0 %v1043_v33, %s1774_s4 }
 0xbc0   :  { %v1046_v6 = vpop.permute.xlu0 %1045 }
 0xbc1   :  { %v2275_v39 = vadd.f32 %v1046_v6, %v1042_v3 }
 0xbc3   :  { %1697 = vtanh.f32 %v2275_v39 }
 0xbd0   :  { %v1698_v43 = vpop.eup %1697 }
 0xbd1   :  { %v2278_v45 = vmul.f32 %v1698_v43, %v1041_v32 }
 0xbd3   :  { %1052 = vrot.lane.b32.xlu1 %v2278_v45, %s1774_s4 }
 0xc45   :  { %v1053_v60 = vpop.permute.xlu1 %1052 }
 0xc46   :  { %1519 = vmatmul.mubr.msk.f32.vlgmr.msra.gmra.mxu1 %vm434_vm6, %v1053_v60  ;;  %v1328_v60 = vld [vmem:[#allocation5 + $0x1f8] sm:$0xff] }
 0xc47   :  { %1536 = vmatpush3.msra.mxu1 %v1280_v49  ;;  %1400 = vmatprep.mubr.f32.mxu1 %v1262_v13  ;;  %v1327_v13 = vld [vmem:[#allocation5 + $0x1f0] sm:$0xff] }
 0xc48   :  { %1537 = vmatprep.subr.mxu1 %v1295_v11  ;;  %v1312_v11 = vld [vmem:[#allocation5 + $0x178] sm:$0xff]  ;;  %1570 = vmatprep.subr.mxu0 %v1328_v60 }
 0xc49   :  { %1538 = vmatpush3.msra.mxu1 %v1279_v56  ;;  %v1311_v56 = vld [vmem:[#allocation5 + $0x170] sm:$0xff] }
 0xc4a   :  { %1539 = vmatprep.subr.mxu1 %v1294_v7  ;;  %v1310_v7 = vld [vmem:[#allocation5 + $0x168] sm:$0xff] }
 0xc4b   :  { %1540 = vmatpush3.msra.mxu1 %v1278_v8  ;;  %v1325_v8 = vld [vmem:[#allocation5 + $0x1e0] sm:$0xff] }
 0xc4c   :  { %1541 = vmatprep.subr.mxu1 %v1293_v10  ;;  %v1309_v10 = vld [vmem:[#allocation5 + $0x160] sm:$0xff] }
 0xc4d   :  { %1542 = vmatpush3.msra.mxu1 %v1277_v58  ;;  %v1324_v58 = vld [vmem:[#allocation5 + $0x1d8] sm:$0xff] }
 0xc4e   :  { %1543 = vmatprep.subr.mxu1 %v1292_v16  ;;  %v1308_v16 = vld [vmem:[#allocation5 + $0x158] sm:$0xff] }
 0xc4f   :  { %1544 = vmatpush3.msra.mxu1 %v1276_v61  ;;  %v1323_v61 = vld [vmem:[#allocation5 + $0x1d0] sm:$0xff] }
 0xc50   :  { %1545 = vmatprep.subr.mxu1 %v1291_v19  ;;  %v1307_v19 = vld [vmem:[#allocation5 + $0x150] sm:$0xff] }
 0xc51   :  { %1546 = vmatpush3.msra.mxu1 %v1275_v52 }
 0xc52   :  { %1547 = vmatprep.subr.mxu1 %v1290_v2  ;;  %v2346_v2 = vsel %vm2011_vm3, %v2071_v55, %v2073_v57  ;;  %v1306_v55 = vld [vmem:[#allocation5 + $0x148] sm:$0xff]  ;;  %v1321_v57 = vld [vmem:[#allocation5 + $0x1c0] sm:$0xff] }
 0xc53   :  { %1548 = vmatpush3.msra.mxu1 %v1274_v46 }
 0xc54   :  { %1549 = vmatprep.subr.mxu1 %v1289_v44 }
 0xc55   :  { %1550 = vmatpush3.msra.mxu1 %v1273_v63 }
 0xc56   :  { %1551 = vmatprep.subr.mxu1 %v1288_v9  ;;  %v2347_v9 = vsel %vm2017_vm4, %v2083_v4, %v2089_v59  ;;  %v1304_v4 = vld [vmem:[#allocation5 + $0x138] sm:$0xff]  ;;  %v1319_v59 = vld [vmem:[#allocation5 + $0x1b0] sm:$0xff] }
 0xc57   :  { %1552 = vmatpush3.msra.mxu1 %v1272_v15 }
 0xc58   :  { %1553 = vmatprep.subr.mxu1 %v1287_v37 }
 0xc59   :  { %1554 = vmatpush3.msra.mxu1 %v1271_v36 }
 0xc5a   :  { %1555 = vmatprep.subr.mxu1 %v1286_v42 }
 0xc5b   :  { %1556 = vmatpush3.msra.mxu1 %v1270_v12 }
 0xc5c   :  { %1557 = vmatprep.subr.mxu1 %v1285_v35 }
 0xc5d   :  { %1558 = vmatpush3.msra.mxu1 %v1269_v41  ;;  %v1320_v41 = vld [vmem:[#allocation5 + $0x1b8] sm:$0xff] }
 0xc5e   :  { %1559 = vmatprep.subr.mxu1 %v1284_v50  ;;  %v1303_v50 = vld [vmem:[#allocation5 + $0x130] sm:$0xff] }
 0xc5f   :  { %1560 = vmatpush3.msra.mxu1 %v1268_v48  ;;  %v1318_v48 = vld [vmem:[#allocation5 + $0x1a8] sm:$0xff] }
 0xc60   :  { %1561 = vmatprep.subr.mxu1 %v1283_v18  ;;  %v1302_v18 = vld [vmem:[#allocation5 + $0x128] sm:$0xff] }
 0xc61   :  { %1562 = vmatpush3.msra.mxu1 %v1267_v20 }
 0xc62   :  { %1563 = vmatprep.subr.mxu1 %v1282_v21  ;;  %v1317_v21 = vld [vmem:[#allocation5 + $0x1a0] sm:$0xff] }
 0xc63   :  { %1564 = vmatpush3.msra.mxu1 %v1266_v22 }
 0xc64   :  { %1565 = vmatprep.subr.mxu1 %v1281_v23  ;;  %v1301_v23 = vld [vmem:[#allocation5 + $0x120] sm:$0xff] }
 0xc65   :  { %1566 = vmatpush3.msra.mxu1 %v1265_v24 }
 0xc66   :  { %1401 = vmatmul.mubr.f32.vlgmr.msra.gmra.mxu1 %v1261_v25 }
 0xd06   :  { %v1122_v26 = vpop.f32.mrf.mxu1 }
 0xd07   :  { %v1127_v27 = vadd.f32 %v1122_v26, %v414_v53  ;;  %v1316_v26 = vld [vmem:[#allocation5 + $0x198] sm:$0xff] }
 0xd08   :  { %v1124_v28 = vpop.f32.mrf.mxu1 }
 0xd09   :  { %v1520_v29 = vmul.f32 -1.442695, %v1127_v27  ;;  %v1128_v30 = vadd.f32 %v1124_v28, %v415_v0  ;;  %v1300_v28 = vld [vmem:[#allocation5 + $0x118] sm:$0xff] }
 0xd0b   :  { %1699 = vpow2.f32 %v1520_v29  ;;  %v1521_v31 = vmul.f32 -1.442695, %v1128_v30  ;;  %v1315_v29 = vld [vmem:[#allocation5 + $0x190] sm:$0xff] }
 0xd0d   :  { %1701 = vpow2.f32 %v1521_v31  ;;  %v1314_v31 = vld [vmem:[#allocation5 + $0x188] sm:$0xff] }
 0xd0e   :  { %1703 = vtanh.f32 %v1128_v30  ;;  %v1299_v30 = vld [vmem:[#allocation5 + $0x110] sm:$0xff] }
 0xd18   :  { %v1700_v38 = vpop.eup %1699 }
 0xd19   :  { %v1137_v32 = vadd.f32 1.0, %v1700_v38  ;;  %v1298_v38 = vld [vmem:[#allocation5 + $0x108] sm:$0xff] }
 0xd1a   :  { %v1702_v54 = vpop.eup %1701 }
 0xd1b   :  { %v1138_v33 = vadd.f32 1.0, %v1702_v54  ;;  %v1704_v62 = vpop.eup %1703  ;;  %v1313_v54 = vld [vmem:[#allocation5 + $0x180] sm:$0xff] }
 0xd1d   :  { %1705 = vrcp.f32 %v1138_v33 }
 0xd1e   :  { %1707 = vrcp.f32 %v1137_v32 }
 0xd2a   :  { %v1706_v47 = vpop.eup %1705 }
 0xd2b   :  { %v1708_v53 = vpop.eup %1707  ;;  %v1144_v34 = vsel %vm399_vm5, %v1704_v62, %v1706_v47 }
 0xd2c   :  { %v1146_v3 = vmul.f32 %v1708_v53, %v1144_v34  ;;  %v1145_v1 = vmul.f32 %v1708_v53, %v2275_v39  ;;  %v1326_v39 = vld [vmem:[#allocation5 + $0x1e8] sm:$0xff] }
 0xd2e   :  { %1148 = vrot.lane.b32.xlu0 %v1146_v3, %s1774_s4  ;;  %v1263_v3 = vsel %vm434_vm6, %v2242_v40, %v2278_v45 }
 0xda0   :  { %v1149_v51 = vpop.permute.xlu0 %1148 }
 0xda1   :  { %v2303_v0 = vadd.f32 %v1149_v51, %v1145_v1  ;;  %v1567_v1 = vpop.f32.mrf.mxu1 }
 0xda3   :  { %1709 = vtanh.f32 %v2303_v0  ;;  %v1568_v51 = vpop.f32.mrf.mxu1 }
 0xdb0   :  { %v1710_v6 = vpop.eup %1709 }
 0xdb1   :  { %v1153_v43 = vmul.f32 %v1710_v6, %v1144_v34  ;;  %v1569_v6 = vadd.f32 %v1568_v51, %v1567_v1 }
 0xdb3   :  { %1155 = vrot.lane.b32.xlu1 %v1153_v43, %s1774_s4  ;;  %v1525_v43 = vld [vmem:[#allocation2] ss:$0 sm:$0xff] }
 0xe25   :  { %v2307_v49 = vpop.permute.xlu1 %1155 }
 0xe26   :  { %1522 = vmatmul.mubr.msk.f32.vlgmr.msra.gmra.mxu0 %vm434_vm6, %v2307_v49 }
 0xe27   :  { %1571 = vmatpush3.msra.mxu0 %v1312_v11  ;;  %v1403_v11 = vadd.f32 %v1569_v6, %v1525_v43 }
 0xe28   :  { %1572 = vmatprep.subr.mxu0 %v1327_v13 }
 0xe29   :  { %1573 = vmatpush3.msra.mxu0 %v1311_v56 }
 0xe2a   :  { %1574 = vmatprep.subr.mxu0 %v1326_v39 }
 0xe2b   :  { %1575 = vmatpush3.msra.mxu0 %v1310_v7 }
 0xe2c   :  { %1576 = vmatprep.subr.mxu0 %v1325_v8 }
 0xe2d   :  { %1577 = vmatpush3.msra.mxu0 %v1309_v10 }
 0xe2e   :  { %1578 = vmatprep.subr.mxu0 %v1324_v58 }
 0xe2f   :  { %1579 = vmatpush3.msra.mxu0 %v1308_v16 }
 0xe30   :  { %1580 = vmatprep.subr.mxu0 %v1323_v61 }
 0xe31   :  { %1581 = vmatpush3.msra.mxu0 %v1307_v19 }
 0xe32   :  { %1582 = vmatprep.subr.mxu0 %v1322_v14 }
 0xe33   :  { %1583 = vmatpush3.msra.mxu0 %v1306_v55 }
 0xe34   :  { %1584 = vmatprep.subr.mxu0 %v1321_v57 }
 0xe35   :  { %1585 = vmatpush3.msra.mxu0 %v1305_v17 }
 0xe36   :  { %1586 = vmatprep.subr.mxu0 %v1320_v41 }
 0xe37   :  { %1587 = vmatpush3.msra.mxu0 %v1304_v4 }
 0xe38   :  { %1588 = vmatprep.subr.mxu0 %v1319_v59 }
 0xe39   :  { %1589 = vmatpush3.msra.mxu0 %v1303_v50 }
 0xe3a   :  { %1590 = vmatprep.subr.mxu0 %v1318_v48 }
 0xe3b   :  { %1591 = vmatpush3.msra.mxu0 %v1302_v18 }
 0xe3c   :  { %1592 = vmatprep.subr.mxu0 %v1317_v21 }
 0xe3d   :  { %1593 = vmatpush3.msra.mxu0 %v1301_v23 }
 0xe3e   :  { %1594 = vmatprep.subr.mxu0 %v1316_v26 }
 0xe3f   :  { %1595 = vmatpush3.msra.mxu0 %v1300_v28 }
 0xe40   :  { %1596 = vmatprep.subr.mxu0 %v1315_v29 }
 0xe41   :  { %1597 = vmatpush3.msra.mxu0 %v1299_v30 }
 0xe42   :  { %1598 = vmatprep.subr.mxu0 %v1314_v31 }
 0xe43   :  { %1599 = vmatpush3.msra.mxu0 %v1298_v38 }
 0xe44   :  { %1600 = vmatprep.subr.mxu0 %v1313_v54 }
 0xe45   :  { %1601 = vmatpush3.msra.mxu0 %v1297_v5 }
 0xee6   :  { %v1225_v52 = vpop.f32.mrf.mxu0 }
 0xee7   :  { %v1230_v46 = vadd.f32 %v1225_v52, %v2346_v2 }
 0xee8   :  { %v1227_v44 = vpop.f32.mrf.mxu0 }
 0xee9   :  { %v1523_v63 = vmul.f32 -1.442695, %v1230_v46  ;;  %v1231_v15 = vadd.f32 %v1227_v44, %v2347_v9 }
 0xeeb   :  { %1711 = vpow2.f32 %v1523_v63  ;;  %v1524_v37 = vmul.f32 -1.442695, %v1231_v15 }
 0xeed   :  { %1713 = vpow2.f32 %v1524_v37 }
 0xeee   :  { %1715 = vtanh.f32 %v1231_v15 }
 0xef8   :  { %v1712_v36 = vpop.eup %1711 }
 0xef9   :  { %v1240_v12 = vadd.f32 1.0, %v1712_v36 }
 0xefa   :  { %v1714_v42 = vpop.eup %1713 }
 0xefb   :  { %v1241_v35 = vadd.f32 1.0, %v1714_v42  ;;  %v1716_v20 = vpop.eup %1715 }
 0xefd   :  { %1717 = vrcp.f32 %v1241_v35 }
 0xefe   :  { %1719 = vrcp.f32 %v1240_v12 }
 0xf0a   :  { %v1718_v22 = vpop.eup %1717 }
 0xf0b   :  { %v1720_v24 = vpop.eup %1719  ;;  %v1247_v25 = vsel %vm399_vm5, %v1716_v20, %v1718_v22 }
 0xf0c   :  { %v1249_v27 = vmul.f32 %v1720_v24, %v1247_v25  ;;  %v1248_v32 = vmul.f32 %v1720_v24, %v2303_v0 }
 0xf0e   :  { %1251 = vrot.lane.b32.xlu0 %v1249_v27, %s1774_s4 }
 0xf80   :  { %v1252_v33 = vpop.permute.xlu0 %1251 }
 0xf81   :  { %v1254_v62 = vadd.f32 %v1252_v33, %v1248_v32 }
 0xf83   :  { %1721 = vtanh.f32 %v1254_v62 }
 0xf90   :  { %v1722_v47 = vpop.eup %1721 }
 0xf91   :  { %v1256_v53 = vmul.f32 %v1722_v47, %v1247_v25 }
 0xf93   :  { %v1264_v34 = vsel %vm434_vm6, %v2307_v49, %v1256_v53 }
 0xf94   :  { %1470 = vmatprep.mubr.f32.mxu0 %v1264_v34 }
 0xf95   :  { %1471 = vmatmul.mubr.f32.vlgmr.msra.gmra.mxu0 %v1263_v3 }
0x1055   :  { %v1602_v60 = vpop.f32.mrf.mxu0 }
0x1057   :  { %v1603_v0 = vpop.f32.mrf.mxu0 }
0x1058   :  { %v1604_v13 = vadd.f32 %v1603_v0, %v1602_v60 }
0x105a   :  { %v1473_v56 = vadd.f32 %v1604_v13, %v1403_v11 }
0x105c   :  { %1477 = vst.msk [vmem:[%s2341_s8] sm:$0xff] %vm1476_vm7, %v1473_v56 }
0x105d   :  { %1482 = vsyncpa [#allocation4], 1 }
0x105e   :  { %1483 = vsyncpa [#allocation6], 1 }

</bundles_post_ra>
